<compile_context>
chip_gen: v7x
topology: tpu7x:2x2x1
jax: 0.10.0
libtpu: 0.0.40
codegen_flags: <defaults>
</compile_context>

<pallas_src>
import functools
import math

import jax
import jax.numpy as jnp
from jax.experimental import pallas as pl
from jax.experimental.pallas import tpu as pltpu

# ---- small deterministic hyper-parameters (stand-ins for the real sizes) -----
B = 2                # batch
C_PRE = 24           # channel axis before CenterCrop
FEAT_SEQ = 16        # CenterCrop target / BatchNorm1d channels      (real: 384)
L = 12               # remaining axis -> transformer sequence length (real: 768)
N_LAYERS_FEAT = 3    # whisper layer axis (we take [..., -1])
D_MODEL = 32         # dim_transformer                               (real: 256)
N_HEAD = 4           # nhead_transformer
HEAD_DIM = D_MODEL // N_HEAD
D_FFN = 2 * D_MODEL  # feed-forward width of the encoder layers
N_ENC_LAYERS = 4     # nlayers_transformer
EPS_BN = 1e-5
EPS_LN = 1e-5
OUT_PAD = 128        # lane-dense padded output width (sliced to 1 in wrapper)

LAYER_KEYS = ("wqkv", "bqkv", "wo", "bo", "ln1_g", "ln1_b",
              "w1", "b1", "w2", "b2", "ln2_g", "ln2_b")
POOL_KEYS = ("att_w1", "att_b1", "att_w2", "att_b2", "att_w3", "att_b3")


# ------------------------------- kernel ---------------------------------------
def _layernorm(x, g, b):
    mu = jnp.mean(x, axis=-1, keepdims=True)
    var = jnp.mean((x - mu) ** 2, axis=-1, keepdims=True)
    return (x - mu) * jax.lax.rsqrt(var + EPS_LN) * g + b


def fused_stack_kernel(x_ref, pw_ref, pb_ref,
                       wqkv_ref, bqkv_ref, wo_ref, bo_ref,
                       ln1g_ref, ln1b_ref, w1_ref, b1_ref, w2_ref, b2_ref,
                       ln2g_ref, ln2b_ref,
                       aw1_ref, ab1_ref, aw2_ref, ab2_ref, aw3_ref, ab3_ref,
                       o_ref, x_sc, *, nhead):
    """One (batch, layer) grid step of the fused stack.

    x_sc (VMEM scratch) holds the resident (T, D) activation across the layer
    axis.  Per-layer weights are full-stack constant blocks indexed by `layer`
    (DMA'd once per kernel).  The projection runs at layer==0, the pooling head
    at the last layer (output block index is constant across the layer axis).
    """
    layer = pl.program_id(1)
    n_layers = pl.num_programs(1)

    # -- layer 0: folded BatchNorm1d + input projection: plain (T,C)@(C,D).
    @pl.when(layer == 0)
    def _():
        xt = x_ref[0].astype(jnp.bfloat16)                       # (T, C)
        proj = jnp.dot(xt, pw_ref[...],
                       preferred_element_type=jnp.float32)       # (T, D)
        x_sc[...] = proj + pb_ref[...]

    x = x_sc[...]                                                # (T, D) f32
    t, d = x.shape
    dh = d // nhead
    xb = x.astype(jnp.bfloat16)

    # fused QKV: ONE (T, D) @ (D, 3D) matmul; 1/sqrt(dh) pre-folded into Q cols.
    qkv = jnp.dot(xb, wqkv_ref[layer],
                  preferred_element_type=jnp.float32) + bqkv_ref[layer]
    q = qkv[:, :d]                                               # D-aligned slices
    k = qkv[:, d:2 * d]
    v = qkv[:, 2 * d:]

    # per-head attention (static unroll): live set ~ one (T,T) f32 tile/head.
    ctx_parts = []
    for h in range(nhead):
        sl = slice(h * dh, (h + 1) * dh)
        qh = q[:, sl].astype(jnp.bfloat16)
        kh = k[:, sl].astype(jnp.bfloat16)
        vh = v[:, sl].astype(jnp.bfloat16)
        s = jax.lax.dot_general(qh, kh, (((1,), (1,)), ((), ())),
                                preferred_element_type=jnp.float32)   # (T, T)
        s = s - jnp.max(s, axis=-1, keepdims=True)
        e = jnp.exp(s)                                           # f32 exp (safe on all gens)
        p = e * pl.reciprocal(jnp.sum(e, axis=-1, keepdims=True), approx=True)
        ctx_parts.append(jnp.dot(p.astype(jnp.bfloat16), vh,
                                 preferred_element_type=jnp.float32))  # (T, dh)
    ctx = jnp.concatenate(ctx_parts, axis=-1).astype(jnp.bfloat16)     # (T, D)

    # output projection: single K=D matmul against the concatenated Wo
    attn = jnp.dot(ctx, wo_ref[layer],
                   preferred_element_type=jnp.float32) + bo_ref[layer]  # (T, D)

    # post-LN encoder layer (nn.TransformerEncoderLayer defaults, relu FFN)
    x = _layernorm(x + attn, ln1g_ref[layer], ln1b_ref[layer])
    h1 = jnp.maximum(
        jnp.dot(x.astype(jnp.bfloat16), w1_ref[layer],
                preferred_element_type=jnp.float32) + b1_ref[layer], 0.0)
    ff = jnp.dot(h1.astype(jnp.bfloat16), w2_ref[layer],
                 preferred_element_type=jnp.float32) + b2_ref[layer]
    x = _layernorm(x + ff, ln2g_ref[layer], ln2b_ref[layer])
    x_sc[...] = x

    # -- last layer: PoolAttFF + final linear + sigmoid (dropout = identity)
    @pl.when(layer == n_layers - 1)
    def _():
        h = jnp.maximum(
            jnp.dot(x.astype(jnp.bfloat16), aw1_ref[...],
                    preferred_element_type=jnp.float32) + ab1_ref[...], 0.0)
        # degenerate N=1 matmuls kept in f32 (MXU-irrelevant)
        att = jnp.dot(h, aw2_ref[...],
                      preferred_element_type=jnp.float32) + ab2_ref[...]   # (T,1)
        att = att - jnp.max(att, axis=0, keepdims=True)
        ea = jnp.exp(att)
        pa = ea * pl.reciprocal(jnp.sum(ea, axis=0, keepdims=True),
                                approx=True)                     # softmax over seq
        pooled = jnp.sum(pa * x, axis=0, keepdims=True)          # (1, D) = att @ x
        logit = jnp.dot(pooled, aw3_ref[...],
                        preferred_element_type=jnp.float32) + ab3_ref[...]  # (1,1)
        sig = 1.0 / (1.0 + jnp.exp(-logit))
        o_ref[0] = jnp.broadcast_to(sig, (1, OUT_PAD))           # lane-dense store


# ------------------------------ pallas wrapper --------------------------------
def _const_spec(arr):
    """Full-array constant block: fetched once per kernel, never re-DMA'd."""
    nd = arr.ndim
    return pl.BlockSpec(arr.shape, lambda b, l, _nd=nd: (0,) * _nd)


def fused_stack(x_tc, prep):
    """x_tc: (B, T, C) cropped features (seq-major) -> (B, 1) scores."""
    bsz, t, c = x_tc.shape
    d, dffn, h = D_MODEL, D_FFN, N_HEAD

    args = ([prep["proj_w"], prep["proj_b"]]
            + [prep[k] for k in LAYER_KEYS]
            + [prep[k] for k in POOL_KEYS])
    in_specs = ([pl.BlockSpec((1, t, c), lambda b, l: (b, 0, 0))]
                + [_const_spec(a) for a in args])

    weight_bytes = sum(int(a.size) * a.dtype.itemsize for a in args)

    # VMEM budget: double-buffered weights + x block + output block, resident
    # activation scratch, and the in-flight working set (one (T,T) head tile,
    # fused QKV, ctx/attn, FFN hidden), plus headroom.  Clamp below v7x's
    # 64 MiB physical VMEM.
    x_block_bytes = t * c * x_tc.dtype.itemsize
    work_bytes = 4 * (3 * t * t + 3 * t * 3 * d + 4 * t * d + 2 * t * dffn)
    vmem_limit = (2 * weight_bytes + 2 * x_block_bytes + 2 * OUT_PAD * 4
                  + t * d * 4 + work_bytes + (8 << 20))
    vmem_limit = int(min(max(vmem_limit, 32 << 20), 60 << 20))

    # advisory cost estimate so XLA schedules the surrounding graph sensibly
    flops_per_b = (2 * t * c * d
                   + N_ENC_LAYERS * (2 * t * d * 3 * d      # fused QKV
                                     + 2 * 2 * t * t * d    # scores + ctx
                                     + 2 * t * d * d        # out proj
                                     + 2 * 2 * t * d * dffn)  # FFN
                   + 2 * t * d * 2 * d + 2 * t * 2 * d + 2 * d)
    transc_per_b = N_ENC_LAYERS * h * t * t + t
    cost = pl.CostEstimate(
        flops=int(bsz * flops_per_b),
        transcendentals=int(bsz * transc_per_b),
        bytes_accessed=int(x_tc.size * x_tc.dtype.itemsize + weight_bytes
                           + bsz * OUT_PAD * 4))

    # NOTE(v7x): batch is the "parallel" (dual-TC) axis; keep deployed batch >= 2
    # (ideally even) or add a query-tile axis so both TensorCores stay busy.
    out = pl.pallas_call(
        functools.partial(fused_stack_kernel, nhead=N_HEAD),
        out_shape=jax.ShapeDtypeStruct((bsz, 1, OUT_PAD), jnp.float32),
        grid_spec=pltpu.PrefetchScalarGridSpec(
            num_scalar_prefetch=0,
            grid=(bsz, N_ENC_LAYERS),
            in_specs=in_specs,
            out_specs=pl.BlockSpec((1, 1, OUT_PAD), lambda b, l: (b, 0, 0)),
            scratch_shapes=[pltpu.VMEM((t, D_MODEL), jnp.float32)]),
        compiler_params=pltpu.CompilerParams(
            dimension_semantics=("parallel", "arbitrary"),
            vmem_limit_bytes=vmem_limit),
        cost_estimate=cost,
    )(x_tc, *args)
    return out[:, 0, :1]                                         # (B, 1)


# ------------------------------ full forward ----------------------------------
def forward(feats, prep):
    # out_feats = self.feat_extract(x)[:, :, :, -1]
    # TODO(synk): feat_extract is a frozen pretrained Whisper; `feats` stands in
    # for its stacked output, we only reproduce the [..., -1] selection here.
    out = feats[:, :, :, -1]                                     # (B, C_PRE, L)
    # CenterCrop(feat_seq) on the channel axis (glue slice)
    start = (out.shape[1] - FEAT_SEQ) // 2
    out = out[:, start:start + FEAT_SEQ, :]                      # (B, FEAT_SEQ, L)
    # present the kernel with a seq-major (B, T, C) slab: the transpose fuses
    # with the slice + crop in XLA and the layer-0 matmul needs no in-kernel
    # transpose.
    x_tc = jnp.transpose(out, (0, 2, 1))                         # (B, L, FEAT_SEQ)
    # BatchNorm1d (folded) + projection + 4 encoder layers + PoolAttFF + sigmoid,
    # all fused in one pallas_call.
    return fused_stack(x_tc, prep)                               # (B, 1)


# ------------------------------ parameters ------------------------------------
def init_params(key):
    """Parameters in the original (PyTorch-like) layout, f32."""
    keys = iter(jax.random.split(key, 128))

    def nrm(shape, scale=0.1):
        return scale * jax.random.normal(next(keys), shape, dtype=jnp.float32)

    params = {
        "bn_gamma": 1.0 + nrm((FEAT_SEQ,)),
        "bn_beta": nrm((FEAT_SEQ,)),
        "bn_mean": nrm((FEAT_SEQ,)),
        "bn_var": 1.0 + 0.1 * jnp.abs(
            jax.random.normal(next(keys), (FEAT_SEQ,), dtype=jnp.float32)),
        "proj_w": nrm((FEAT_SEQ, D_MODEL)),
        "proj_b": nrm((1, D_MODEL)),
        "layers": [],
        "pool": {
            "w1": nrm((D_MODEL, 2 * D_MODEL)), "b1": nrm((1, 2 * D_MODEL)),
            "w2": nrm((2 * D_MODEL, 1)), "b2": nrm((1, 1)),
            "w3": nrm((D_MODEL, 1)), "b3": nrm((1, 1)),
        },
    }
    for _ in range(N_ENC_LAYERS):
        params["layers"].append({
            "wq": nrm((D_MODEL, D_MODEL)), "bq": nrm((1, D_MODEL)),
            "wk": nrm((D_MODEL, D_MODEL)), "bk": nrm((1, D_MODEL)),
            "wv": nrm((D_MODEL, D_MODEL)), "bv": nrm((1, D_MODEL)),
            "wo": nrm((D_MODEL, D_MODEL)), "bo": nrm((1, D_MODEL)),
            "ln1_g": 1.0 + nrm((1, D_MODEL)), "ln1_b": nrm((1, D_MODEL)),
            "w1": nrm((D_MODEL, D_FFN)), "b1": nrm((1, D_FFN)),
            "w2": nrm((D_FFN, D_MODEL)), "b2": nrm((1, D_MODEL)),
            "ln2_g": 1.0 + nrm((1, D_MODEL)), "ln2_b": nrm((1, D_MODEL)),
        })
    return params


def prepare_params(params):
    """Fold BN into the projection, fold 1/sqrt(head_dim) into Q, build the
    column-blocked [Q|K|V] fused weight, stack per-layer weights on a leading
    layer axis, and cast matmul weights to bf16. Runs once, in plain JAX."""
    # exact fold of eval-mode BatchNorm1d into the input projection
    scale = params["bn_gamma"] * jax.lax.rsqrt(params["bn_var"] + EPS_BN)
    shift = params["bn_beta"] - params["bn_mean"] * scale
    proj_w = params["proj_w"]
    prep = {
        "proj_w": (scale[:, None] * proj_w).astype(jnp.bfloat16),
        "proj_b": (params["proj_b"] + shift[None, :] @ proj_w).astype(jnp.float32),
    }

    q_scale = 1.0 / math.sqrt(HEAD_DIM)      # folded into Q columns / bias
    stacks = {k: [] for k in LAYER_KEYS}
    for lp in params["layers"]:
        wqkv = jnp.concatenate(
            [lp["wq"] * q_scale, lp["wk"], lp["wv"]], axis=1)    # (D, 3D)
        bqkv = jnp.concatenate(
            [lp["bq"] * q_scale, lp["bk"], lp["bv"]], axis=1)    # (1, 3D)
        stacks["wqkv"].append(wqkv.astype(jnp.bfloat16))
        stacks["bqkv"].append(bqkv.astype(jnp.float32))
        stacks["wo"].append(lp["wo"].astype(jnp.bfloat16))       # (D, D) concat-Wo
        stacks["bo"].append(lp["bo"])
        stacks["ln1_g"].append(lp["ln1_g"])
        stacks["ln1_b"].append(lp["ln1_b"])
        stacks["w1"].append(lp["w1"].astype(jnp.bfloat16))
        stacks["b1"].append(lp["b1"])
        stacks["w2"].append(lp["w2"].astype(jnp.bfloat16))
        stacks["b2"].append(lp["b2"])
        stacks["ln2_g"].append(lp["ln2_g"])
        stacks["ln2_b"].append(lp["ln2_b"])
    for kk, vv in stacks.items():
        prep[kk] = jnp.stack(vv)                                 # leading layer axis

    pool = params["pool"]
    prep["att_w1"] = pool["w1"].astype(jnp.bfloat16)
    prep["att_b1"] = pool["b1"]
    prep["att_w2"] = pool["w2"]        # N=1 matmuls kept f32 (MXU-irrelevant)
    prep["att_b2"] = pool["b2"]
    prep["att_w3"] = pool["w3"]
    prep["att_b3"] = pool["b3"]
    return prep


# ---------------------- pure-JAX reference (same prep) -------------------------
def reference_forward(feats, prep):
    out = feats[:, :, :, -1]
    start = (out.shape[1] - FEAT_SEQ) // 2
    x_cl = out[:, start:start + FEAT_SEQ, :]                     # (B, C, T)
    x = jnp.einsum("bct,cd->btd", x_cl, prep["proj_w"].astype(jnp.float32))
    x = x + prep["proj_b"]
    bsz, t, _ = x.shape
    for l in range(N_ENC_LAYERS):
        qkv = x @ prep["wqkv"][l].astype(jnp.float32) + prep["bqkv"][l]
        q = qkv[..., :D_MODEL]
        k = qkv[..., D_MODEL:2 * D_MODEL]
        v = qkv[..., 2 * D_MODEL:]
        qh = q.reshape(bsz, t, N_HEAD, HEAD_DIM)
        kh = k.reshape(bsz, t, N_HEAD, HEAD_DIM)
        vh = v.reshape(bsz, t, N_HEAD, HEAD_DIM)
        s = jnp.einsum("bqhd,bkhd->bhqk", qh, kh)                # scale pre-folded
        p = jax.nn.softmax(s, axis=-1)
        ctx = jnp.einsum("bhqk,bkhd->bqhd", p, vh).reshape(bsz, t, D_MODEL)
        attn = ctx @ prep["wo"][l].astype(jnp.float32) + prep["bo"][l]
        x = _layernorm(x + attn, prep["ln1_g"][l], prep["ln1_b"][l])
        h1 = jax.nn.relu(x @ prep["w1"][l].astype(jnp.float32) + prep["b1"][l])
        ff = h1 @ prep["w2"][l].astype(jnp.float32) + prep["b2"][l]
        x = _layernorm(x + ff, prep["ln2_g"][l], prep["ln2_b"][l])
    hh = jax.nn.relu(x @ prep["att_w1"].astype(jnp.float32) + prep["att_b1"])
    att = hh @ prep["att_w2"] + prep["att_b2"]                   # (B, T, 1)
    att = jax.nn.softmax(att, axis=1)
    pooled = jnp.sum(att * x, axis=1)                            # (B, D)
    logit = pooled @ prep["att_w3"] + prep["att_b3"]             # (B, 1)
    return jax.nn.sigmoid(logit)


# ----------------------------------- main --------------------------------------
if __name__ == "__main__":
    key = jax.random.PRNGKey(0)
    k_feat, k_par = jax.random.split(key)
    # stands for feat_extract(x) output: (B, channels, frames, whisper_layers)
    feats = jax.random.normal(
        k_feat, (B, C_PRE, L, N_LAYERS_FEAT), dtype=jnp.float32)
    params = init_params(k_par)
    prep = prepare_params(params)

    out = forward(feats, prep)
    out = jax.block_until_ready(out)

    assert out.shape == (B, 1), out.shape
    assert bool(jnp.all(jnp.isfinite(out)))
    assert bool(jnp.all((out > 0.0) & (out < 1.0)))   # sigmoid output range

    ref = reference_forward(feats, prep)
    assert bool(jnp.max(jnp.abs(out - ref)) < 3e-2), (out, ref)

    print("KERNEL_OK")
</pallas_src>

<mosaic_0001>
module attributes {stable_mosaic.version = 11 : i64} {
  func.func @fused_stack_kernel(%arg0: i32, %arg1: i32, %arg2: memref<1x12x16xf32, #tpu.memory_space<vmem>>, %arg3: memref<16x32xbf16, #tpu.memory_space<vmem>>, %arg4: memref<1x32xf32, #tpu.memory_space<vmem>>, %arg5: memref<4x32x96xbf16, #tpu.memory_space<vmem>>, %arg6: memref<4x1x96xf32, #tpu.memory_space<vmem>>, %arg7: memref<4x32x32xbf16, #tpu.memory_space<vmem>>, %arg8: memref<4x1x32xf32, #tpu.memory_space<vmem>>, %arg9: memref<4x1x32xf32, #tpu.memory_space<vmem>>, %arg10: memref<4x1x32xf32, #tpu.memory_space<vmem>>, %arg11: memref<4x32x64xbf16, #tpu.memory_space<vmem>>, %arg12: memref<4x1x64xf32, #tpu.memory_space<vmem>>, %arg13: memref<4x64x32xbf16, #tpu.memory_space<vmem>>, %arg14: memref<4x1x32xf32, #tpu.memory_space<vmem>>, %arg15: memref<4x1x32xf32, #tpu.memory_space<vmem>>, %arg16: memref<4x1x32xf32, #tpu.memory_space<vmem>>, %arg17: memref<32x64xbf16, #tpu.memory_space<vmem>>, %arg18: memref<1x64xf32, #tpu.memory_space<vmem>>, %arg19: memref<64x1xf32, #tpu.memory_space<vmem>>, %arg20: memref<1x1xf32, #tpu.memory_space<vmem>>, %arg21: memref<32x1xf32, #tpu.memory_space<vmem>>, %arg22: memref<1x1xf32, #tpu.memory_space<vmem>>, %arg23: memref<1x1x128xf32, #tpu.memory_space<vmem>>, %arg24: memref<12x32xf32, #tpu.memory_space<vmem>>) attributes {dimension_semantics = [#tpu.dimension_semantics<parallel>, #tpu.dimension_semantics<arbitrary>], iteration_bounds = array<i64: 2, 4>, scalar_prefetch = 0 : i64, scratch_operands = 1 : i64, tpu.core_type = #tpu.core_type<tc>, window_params = [{transform_indices = @transform_0, window_bounds = array<i64: 1, 12, 16>}, {pipeline_mode = #tpu.pipeline_mode<synchronous>, transform_indices = @transform_1, window_bounds = array<i64: 16, 32>}, {pipeline_mode = #tpu.pipeline_mode<synchronous>, transform_indices = @transform_2, window_bounds = array<i64: 1, 32>}, {pipeline_mode = #tpu.pipeline_mode<synchronous>, transform_indices = @transform_3, window_bounds = array<i64: 4, 32, 96>}, {pipeline_mode = #tpu.pipeline_mode<synchronous>, transform_indices = @transform_4, window_bounds = array<i64: 4, 1, 96>}, {pipeline_mode = #tpu.pipeline_mode<synchronous>, transform_indices = @transform_5, window_bounds = array<i64: 4, 32, 32>}, {pipeline_mode = #tpu.pipeline_mode<synchronous>, transform_indices = @transform_6, window_bounds = array<i64: 4, 1, 32>}, {pipeline_mode = #tpu.pipeline_mode<synchronous>, transform_indices = @transform_7, window_bounds = array<i64: 4, 1, 32>}, {pipeline_mode = #tpu.pipeline_mode<synchronous>, transform_indices = @transform_8, window_bounds = array<i64: 4, 1, 32>}, {pipeline_mode = #tpu.pipeline_mode<synchronous>, transform_indices = @transform_9, window_bounds = array<i64: 4, 32, 64>}, {pipeline_mode = #tpu.pipeline_mode<synchronous>, transform_indices = @transform_10, window_bounds = array<i64: 4, 1, 64>}, {pipeline_mode = #tpu.pipeline_mode<synchronous>, transform_indices = @transform_11, window_bounds = array<i64: 4, 64, 32>}, {pipeline_mode = #tpu.pipeline_mode<synchronous>, transform_indices = @transform_12, window_bounds = array<i64: 4, 1, 32>}, {pipeline_mode = #tpu.pipeline_mode<synchronous>, transform_indices = @transform_13, window_bounds = array<i64: 4, 1, 32>}, {pipeline_mode = #tpu.pipeline_mode<synchronous>, transform_indices = @transform_14, window_bounds = array<i64: 4, 1, 32>}, {pipeline_mode = #tpu.pipeline_mode<synchronous>, transform_indices = @transform_15, window_bounds = array<i64: 32, 64>}, {pipeline_mode = #tpu.pipeline_mode<synchronous>, transform_indices = @transform_16, window_bounds = array<i64: 1, 64>}, {pipeline_mode = #tpu.pipeline_mode<synchronous>, transform_indices = @transform_17, window_bounds = array<i64: 64, 1>}, {pipeline_mode = #tpu.pipeline_mode<synchronous>, transform_indices = @transform_18, window_bounds = array<i64: 1, 1>}, {pipeline_mode = #tpu.pipeline_mode<synchronous>, transform_indices = @transform_19, window_bounds = array<i64: 32, 1>}, {pipeline_mode = #tpu.pipeline_mode<synchronous>, transform_indices = @transform_20, window_bounds = array<i64: 1, 1>}, {transform_indices = @transform_21, window_bounds = array<i64: 1, 1, 128>}]} {
    %c0_i32 = arith.constant 0 : i32
    %0 = arith.cmpi eq, %arg1, %c0_i32 : i32
    %1 = arith.extui %0 : i1 to i32
    %c0_i32_0 = arith.constant 0 : i32
    %2 = arith.cmpi ne, %1, %c0_i32_0 : i32
    scf.if %2 {
      %c0_59 = arith.constant 0 : index
      %c0_60 = arith.constant 0 : index
      %c0_61 = arith.constant 0 : index
      %188 = vector.load %arg2[%c0_59, %c0_60, %c0_61] : memref<1x12x16xf32, #tpu.memory_space<vmem>>, vector<1x12x16xf32>
      %189 = vector.shape_cast %188 : vector<1x12x16xf32> to vector<12x16xf32>
      %190 = arith.truncf %189 : vector<12x16xf32> to vector<12x16xbf16>
      %c0_62 = arith.constant 0 : index
      %c0_63 = arith.constant 0 : index
      %191 = vector.load %arg3[%c0_62, %c0_63] : memref<16x32xbf16, #tpu.memory_space<vmem>>, vector<16x32xbf16>
      %cst_64 = arith.constant dense<0.000000e+00> : vector<12x32xf32>
      %192 = tpu.matmul %190, %191, %cst_64 {dimension_numbers = #tpu.dot_dimension_numbers<[1], [0], [0], [1], [0, 0, 1, 1], [], []>} : vector<12x16xbf16>, vector<16x32xbf16>, vector<12x32xf32> -> vector<12x32xf32>
      %c0_65 = arith.constant 0 : index
      %c0_66 = arith.constant 0 : index
      %193 = vector.load %arg4[%c0_65, %c0_66] : memref<1x32xf32, #tpu.memory_space<vmem>>, vector<1x32xf32>
      %194 = vector.broadcast %193 : vector<1x32xf32> to vector<12x32xf32>
      %195 = arith.addf %192, %194 : vector<12x32xf32>
      %c0_67 = arith.constant 0 : index
      %c0_68 = arith.constant 0 : index
      %196 = vector.load %arg24[%c0_67, %c0_68] : memref<12x32xf32, #tpu.memory_space<vmem>>, vector<12x32xf32>
      tpu.vector_store %arg24[%c0_67, %c0_68], %195 {strides = array<i32>} : memref<12x32xf32, #tpu.memory_space<vmem>>, vector<12x32xf32>,
    } else {
    }
    %c0 = arith.constant 0 : index
    %c0_1 = arith.constant 0 : index
    %3 = vector.load %arg24[%c0, %c0_1] : memref<12x32xf32, #tpu.memory_space<vmem>>, vector<12x32xf32>
    %4 = arith.truncf %3 : vector<12x32xf32> to vector<12x32xbf16>
    %5 = arith.index_cast %arg1 : i32 to index
    %c0_2 = arith.constant 0 : index
    %c0_3 = arith.constant 0 : index
    %6 = vector.load %arg5[%5, %c0_2, %c0_3] : memref<4x32x96xbf16, #tpu.memory_space<vmem>>, vector<1x32x96xbf16>
    %7 = vector.shape_cast %6 : vector<1x32x96xbf16> to vector<32x96xbf16>
    %cst = arith.constant dense<0.000000e+00> : vector<12x96xf32>
    %8 = tpu.matmul %4, %7, %cst {dimension_numbers = #tpu.dot_dimension_numbers<[1], [0], [0], [1], [0, 0, 1, 1], [], []>} : vector<12x32xbf16>, vector<32x96xbf16>, vector<12x96xf32> -> vector<12x96xf32>
    %9 = arith.index_cast %arg1 : i32 to index
    %c0_4 = arith.constant 0 : index
    %c0_5 = arith.constant 0 : index
    %10 = vector.load %arg6[%9, %c0_4, %c0_5] : memref<4x1x96xf32, #tpu.memory_space<vmem>>, vector<1x1x96xf32>
    %11 = vector.shape_cast %10 : vector<1x1x96xf32> to vector<1x96xf32>
    %12 = vector.broadcast %11 : vector<1x96xf32> to vector<12x96xf32>
    %13 = arith.addf %8, %12 : vector<12x96xf32>
    %14 = vector.extract_strided_slice %13 {offsets = [0, 0], sizes = [12, 32], strides = [1, 1]} : vector<12x96xf32> to vector<12x32xf32>
    %15 = vector.extract_strided_slice %13 {offsets = [0, 32], sizes = [12, 32], strides = [1, 1]} : vector<12x96xf32> to vector<12x32xf32>
    %16 = vector.extract_strided_slice %13 {offsets = [0, 64], sizes = [12, 32], strides = [1, 1]} : vector<12x96xf32> to vector<12x32xf32>
    %17 = vector.extract_strided_slice %14 {offsets = [0, 0], sizes = [12, 8], strides = [1, 1]} : vector<12x32xf32> to vector<12x8xf32>
    %18 = arith.truncf %17 : vector<12x8xf32> to vector<12x8xbf16>
    %19 = vector.extract_strided_slice %15 {offsets = [0, 0], sizes = [12, 8], strides = [1, 1]} : vector<12x32xf32> to vector<12x8xf32>
    %20 = arith.truncf %19 : vector<12x8xf32> to vector<12x8xbf16>
    %21 = vector.extract_strided_slice %16 {offsets = [0, 0], sizes = [12, 8], strides = [1, 1]} : vector<12x32xf32> to vector<12x8xf32>
    %22 = arith.truncf %21 : vector<12x8xf32> to vector<12x8xbf16>
    %cst_6 = arith.constant dense<0.000000e+00> : vector<12x12xf32>
    %23 = tpu.matmul %18, %20, %cst_6 {dimension_numbers = #tpu.dot_dimension_numbers<[1], [1], [0], [0], [0, 0, 1, 0], [], []>} : vector<12x8xbf16>, vector<12x8xbf16>, vector<12x12xf32> -> vector<12x12xf32>
    %cst_7 = arith.constant dense<0xFF800000> : vector<12xf32>
    %24 = vector.multi_reduction <maximumf>, %23, %cst_7 [1] : vector<12x12xf32> to vector<12xf32>
    %25 = vector.shape_cast %24 : vector<12xf32> to vector<12x1xf32>
    %26 = vector.broadcast %25 : vector<12x1xf32> to vector<12x12xf32>
    %27 = arith.subf %23, %26 : vector<12x12xf32>
    %28 = math.exp %27 : vector<12x12xf32>
    %cst_8 = arith.constant dense<0.000000e+00> : vector<12xf32>
    %29 = vector.multi_reduction <add>, %28, %cst_8 [1] : vector<12x12xf32> to vector<12xf32>
    %30 = vector.shape_cast %29 : vector<12xf32> to vector<12x1xf32>
    %31 = tpu.reciprocal %30 {approx = true} : vector<12x1xf32> -> vector<12x1xf32>
    %32 = vector.broadcast %31 : vector<12x1xf32> to vector<12x12xf32>
    %33 = arith.mulf %28, %32 : vector<12x12xf32>
    %34 = arith.truncf %33 : vector<12x12xf32> to vector<12x12xbf16>
    %cst_9 = arith.constant dense<0.000000e+00> : vector<12x8xf32>
    %35 = tpu.matmul %34, %22, %cst_9 {dimension_numbers = #tpu.dot_dimension_numbers<[1], [0], [0], [1], [0, 0, 1, 1], [], []>} : vector<12x12xbf16>, vector<12x8xbf16>, vector<12x8xf32> -> vector<12x8xf32>
    %36 = vector.extract_strided_slice %14 {offsets = [0, 8], sizes = [12, 8], strides = [1, 1]} : vector<12x32xf32> to vector<12x8xf32>
    %37 = arith.truncf %36 : vector<12x8xf32> to vector<12x8xbf16>
    %38 = vector.extract_strided_slice %15 {offsets = [0, 8], sizes = [12, 8], strides = [1, 1]} : vector<12x32xf32> to vector<12x8xf32>
    %39 = arith.truncf %38 : vector<12x8xf32> to vector<12x8xbf16>
    %40 = vector.extract_strided_slice %16 {offsets = [0, 8], sizes = [12, 8], strides = [1, 1]} : vector<12x32xf32> to vector<12x8xf32>
    %41 = arith.truncf %40 : vector<12x8xf32> to vector<12x8xbf16>
    %cst_10 = arith.constant dense<0.000000e+00> : vector<12x12xf32>
    %42 = tpu.matmul %37, %39, %cst_10 {dimension_numbers = #tpu.dot_dimension_numbers<[1], [1], [0], [0], [0, 0, 1, 0], [], []>} : vector<12x8xbf16>, vector<12x8xbf16>, vector<12x12xf32> -> vector<12x12xf32>
    %cst_11 = arith.constant dense<0xFF800000> : vector<12xf32>
    %43 = vector.multi_reduction <maximumf>, %42, %cst_11 [1] : vector<12x12xf32> to vector<12xf32>
    %44 = vector.shape_cast %43 : vector<12xf32> to vector<12x1xf32>
    %45 = vector.broadcast %44 : vector<12x1xf32> to vector<12x12xf32>
    %46 = arith.subf %42, %45 : vector<12x12xf32>
    %47 = math.exp %46 : vector<12x12xf32>
    %cst_12 = arith.constant dense<0.000000e+00> : vector<12xf32>
    %48 = vector.multi_reduction <add>, %47, %cst_12 [1] : vector<12x12xf32> to vector<12xf32>
    %49 = vector.shape_cast %48 : vector<12xf32> to vector<12x1xf32>
    %50 = tpu.reciprocal %49 {approx = true} : vector<12x1xf32> -> vector<12x1xf32>
    %51 = vector.broadcast %50 : vector<12x1xf32> to vector<12x12xf32>
    %52 = arith.mulf %47, %51 : vector<12x12xf32>
    %53 = arith.truncf %52 : vector<12x12xf32> to vector<12x12xbf16>
    %cst_13 = arith.constant dense<0.000000e+00> : vector<12x8xf32>
    %54 = tpu.matmul %53, %41, %cst_13 {dimension_numbers = #tpu.dot_dimension_numbers<[1], [0], [0], [1], [0, 0, 1, 1], [], []>} : vector<12x12xbf16>, vector<12x8xbf16>, vector<12x8xf32> -> vector<12x8xf32>
    %55 = vector.extract_strided_slice %14 {offsets = [0, 16], sizes = [12, 8], strides = [1, 1]} : vector<12x32xf32> to vector<12x8xf32>
    %56 = arith.truncf %55 : vector<12x8xf32> to vector<12x8xbf16>
    %57 = vector.extract_strided_slice %15 {offsets = [0, 16], sizes = [12, 8], strides = [1, 1]} : vector<12x32xf32> to vector<12x8xf32>
    %58 = arith.truncf %57 : vector<12x8xf32> to vector<12x8xbf16>
    %59 = vector.extract_strided_slice %16 {offsets = [0, 16], sizes = [12, 8], strides = [1, 1]} : vector<12x32xf32> to vector<12x8xf32>
    %60 = arith.truncf %59 : vector<12x8xf32> to vector<12x8xbf16>
    %cst_14 = arith.constant dense<0.000000e+00> : vector<12x12xf32>
    %61 = tpu.matmul %56, %58, %cst_14 {dimension_numbers = #tpu.dot_dimension_numbers<[1], [1], [0], [0], [0, 0, 1, 0], [], []>} : vector<12x8xbf16>, vector<12x8xbf16>, vector<12x12xf32> -> vector<12x12xf32>
    %cst_15 = arith.constant dense<0xFF800000> : vector<12xf32>
    %62 = vector.multi_reduction <maximumf>, %61, %cst_15 [1] : vector<12x12xf32> to vector<12xf32>
    %63 = vector.shape_cast %62 : vector<12xf32> to vector<12x1xf32>
    %64 = vector.broadcast %63 : vector<12x1xf32> to vector<12x12xf32>
    %65 = arith.subf %61, %64 : vector<12x12xf32>
    %66 = math.exp %65 : vector<12x12xf32>
    %cst_16 = arith.constant dense<0.000000e+00> : vector<12xf32>
    %67 = vector.multi_reduction <add>, %66, %cst_16 [1] : vector<12x12xf32> to vector<12xf32>
    %68 = vector.shape_cast %67 : vector<12xf32> to vector<12x1xf32>
    %69 = tpu.reciprocal %68 {approx = true} : vector<12x1xf32> -> vector<12x1xf32>
    %70 = vector.broadcast %69 : vector<12x1xf32> to vector<12x12xf32>
    %71 = arith.mulf %66, %70 : vector<12x12xf32>
    %72 = arith.truncf %71 : vector<12x12xf32> to vector<12x12xbf16>
    %cst_17 = arith.constant dense<0.000000e+00> : vector<12x8xf32>
    %73 = tpu.matmul %72, %60, %cst_17 {dimension_numbers = #tpu.dot_dimension_numbers<[1], [0], [0], [1], [0, 0, 1, 1], [], []>} : vector<12x12xbf16>, vector<12x8xbf16>, vector<12x8xf32> -> vector<12x8xf32>
    %74 = vector.extract_strided_slice %14 {offsets = [0, 24], sizes = [12, 8], strides = [1, 1]} : vector<12x32xf32> to vector<12x8xf32>
    %75 = arith.truncf %74 : vector<12x8xf32> to vector<12x8xbf16>
    %76 = vector.extract_strided_slice %15 {offsets = [0, 24], sizes = [12, 8], strides = [1, 1]} : vector<12x32xf32> to vector<12x8xf32>
    %77 = arith.truncf %76 : vector<12x8xf32> to vector<12x8xbf16>
    %78 = vector.extract_strided_slice %16 {offsets = [0, 24], sizes = [12, 8], strides = [1, 1]} : vector<12x32xf32> to vector<12x8xf32>
    %79 = arith.truncf %78 : vector<12x8xf32> to vector<12x8xbf16>
    %cst_18 = arith.constant dense<0.000000e+00> : vector<12x12xf32>
    %80 = tpu.matmul %75, %77, %cst_18 {dimension_numbers = #tpu.dot_dimension_numbers<[1], [1], [0], [0], [0, 0, 1, 0], [], []>} : vector<12x8xbf16>, vector<12x8xbf16>, vector<12x12xf32> -> vector<12x12xf32>
    %cst_19 = arith.constant dense<0xFF800000> : vector<12xf32>
    %81 = vector.multi_reduction <maximumf>, %80, %cst_19 [1] : vector<12x12xf32> to vector<12xf32>
    %82 = vector.shape_cast %81 : vector<12xf32> to vector<12x1xf32>
    %83 = vector.broadcast %82 : vector<12x1xf32> to vector<12x12xf32>
    %84 = arith.subf %80, %83 : vector<12x12xf32>
    %85 = math.exp %84 : vector<12x12xf32>
    %cst_20 = arith.constant dense<0.000000e+00> : vector<12xf32>
    %86 = vector.multi_reduction <add>, %85, %cst_20 [1] : vector<12x12xf32> to vector<12xf32>
    %87 = vector.shape_cast %86 : vector<12xf32> to vector<12x1xf32>
    %88 = tpu.reciprocal %87 {approx = true} : vector<12x1xf32> -> vector<12x1xf32>
    %89 = vector.broadcast %88 : vector<12x1xf32> to vector<12x12xf32>
    %90 = arith.mulf %85, %89 : vector<12x12xf32>
    %91 = arith.truncf %90 : vector<12x12xf32> to vector<12x12xbf16>
    %cst_21 = arith.constant dense<0.000000e+00> : vector<12x8xf32>
    %92 = tpu.matmul %91, %79, %cst_21 {dimension_numbers = #tpu.dot_dimension_numbers<[1], [0], [0], [1], [0, 0, 1, 1], [], []>} : vector<12x12xbf16>, vector<12x8xbf16>, vector<12x8xf32> -> vector<12x8xf32>
    %93 = tpu.concatenate %35, %54, %73, %92 in 1 : vector<12x8xf32>, vector<12x8xf32>, vector<12x8xf32>, vector<12x8xf32> -> vector<12x32xf32>
    %94 = arith.truncf %93 : vector<12x32xf32> to vector<12x32xbf16>
    %95 = arith.index_cast %arg1 : i32 to index
    %c0_22 = arith.constant 0 : index
    %c0_23 = arith.constant 0 : index
    %96 = vector.load %arg7[%95, %c0_22, %c0_23] : memref<4x32x32xbf16, #tpu.memory_space<vmem>>, vector<1x32x32xbf16>
    %97 = vector.shape_cast %96 : vector<1x32x32xbf16> to vector<32x32xbf16>
    %cst_24 = arith.constant dense<0.000000e+00> : vector<12x32xf32>
    %98 = tpu.matmul %94, %97, %cst_24 {dimension_numbers = #tpu.dot_dimension_numbers<[1], [0], [0], [1], [0, 0, 1, 1], [], []>} : vector<12x32xbf16>, vector<32x32xbf16>, vector<12x32xf32> -> vector<12x32xf32>
    %99 = arith.index_cast %arg1 : i32 to index
    %c0_25 = arith.constant 0 : index
    %c0_26 = arith.constant 0 : index
    %100 = vector.load %arg8[%99, %c0_25, %c0_26] : memref<4x1x32xf32, #tpu.memory_space<vmem>>, vector<1x1x32xf32>
    %101 = vector.shape_cast %100 : vector<1x1x32xf32> to vector<1x32xf32>
    %102 = vector.broadcast %101 : vector<1x32xf32> to vector<12x32xf32>
    %103 = arith.addf %98, %102 : vector<12x32xf32>
    %104 = arith.addf %3, %103 : vector<12x32xf32>
    %105 = arith.index_cast %arg1 : i32 to index
    %c0_27 = arith.constant 0 : index
    %c0_28 = arith.constant 0 : index
    %106 = vector.load %arg9[%105, %c0_27, %c0_28] : memref<4x1x32xf32, #tpu.memory_space<vmem>>, vector<1x1x32xf32>
    %107 = vector.shape_cast %106 : vector<1x1x32xf32> to vector<1x32xf32>
    %108 = arith.index_cast %arg1 : i32 to index
    %c0_29 = arith.constant 0 : index
    %c0_30 = arith.constant 0 : index
    %109 = vector.load %arg10[%108, %c0_29, %c0_30] : memref<4x1x32xf32, #tpu.memory_space<vmem>>, vector<1x1x32xf32>
    %110 = vector.shape_cast %109 : vector<1x1x32xf32> to vector<1x32xf32>
    %cst_31 = arith.constant dense<0.000000e+00> : vector<12xf32>
    %111 = vector.multi_reduction <add>, %104, %cst_31 [1] : vector<12x32xf32> to vector<12xf32>
    %112 = vector.shape_cast %111 : vector<12xf32> to vector<12x1xf32>
    %cst_32 = arith.constant 3.200000e+01 : f32
    %113 = vector.broadcast %cst_32 : f32 to vector<12x1xf32>
    %114 = arith.divf %112, %113 : vector<12x1xf32>
    %115 = vector.broadcast %114 : vector<12x1xf32> to vector<12x32xf32>
    %116 = arith.subf %104, %115 : vector<12x32xf32>
    %117 = arith.mulf %116, %116 : vector<12x32xf32>
    %cst_33 = arith.constant dense<0.000000e+00> : vector<12xf32>
    %118 = vector.multi_reduction <add>, %117, %cst_33 [1] : vector<12x32xf32> to vector<12xf32>
    %119 = vector.shape_cast %118 : vector<12xf32> to vector<12x1xf32>
    %cst_34 = arith.constant 3.200000e+01 : f32
    %120 = vector.broadcast %cst_34 : f32 to vector<12x1xf32>
    %121 = arith.divf %119, %120 : vector<12x1xf32>
    %122 = vector.broadcast %114 : vector<12x1xf32> to vector<12x32xf32>
    %123 = arith.subf %104, %122 : vector<12x32xf32>
    %cst_35 = arith.constant 9.99999974E-6 : f32
    %124 = vector.broadcast %cst_35 : f32 to vector<12x1xf32>
    %125 = arith.addf %121, %124 : vector<12x1xf32>
    %126 = math.rsqrt %125 : vector<12x1xf32>
    %127 = vector.broadcast %126 : vector<12x1xf32> to vector<12x32xf32>
    %128 = arith.mulf %123, %127 : vector<12x32xf32>
    %129 = vector.broadcast %107 : vector<1x32xf32> to vector<12x32xf32>
    %130 = arith.mulf %128, %129 : vector<12x32xf32>
    %131 = vector.broadcast %110 : vector<1x32xf32> to vector<12x32xf32>
    %132 = arith.addf %130, %131 : vector<12x32xf32>
    %133 = arith.truncf %132 : vector<12x32xf32> to vector<12x32xbf16>
    %134 = arith.index_cast %arg1 : i32 to index
    %c0_36 = arith.constant 0 : index
    %c0_37 = arith.constant 0 : index
    %135 = vector.load %arg11[%134, %c0_36, %c0_37] : memref<4x32x64xbf16, #tpu.memory_space<vmem>>, vector<1x32x64xbf16>
    %136 = vector.shape_cast %135 : vector<1x32x64xbf16> to vector<32x64xbf16>
    %cst_38 = arith.constant dense<0.000000e+00> : vector<12x64xf32>
    %137 = tpu.matmul %133, %136, %cst_38 {dimension_numbers = #tpu.dot_dimension_numbers<[1], [0], [0], [1], [0, 0, 1, 1], [], []>} : vector<12x32xbf16>, vector<32x64xbf16>, vector<12x64xf32> -> vector<12x64xf32>
    %138 = arith.index_cast %arg1 : i32 to index
    %c0_39 = arith.constant 0 : index
    %c0_40 = arith.constant 0 : index
    %139 = vector.load %arg12[%138, %c0_39, %c0_40] : memref<4x1x64xf32, #tpu.memory_space<vmem>>, vector<1x1x64xf32>
    %140 = vector.shape_cast %139 : vector<1x1x64xf32> to vector<1x64xf32>
    %141 = vector.broadcast %140 : vector<1x64xf32> to vector<12x64xf32>
    %142 = arith.addf %137, %141 : vector<12x64xf32>
    %cst_41 = arith.constant 0.000000e+00 : f32
    %143 = vector.broadcast %cst_41 : f32 to vector<12x64xf32>
    %144 = arith.maximumf %142, %143 : vector<12x64xf32>
    %145 = arith.truncf %144 : vector<12x64xf32> to vector<12x64xbf16>
    %146 = arith.index_cast %arg1 : i32 to index
    %c0_42 = arith.constant 0 : index
    %c0_43 = arith.constant 0 : index
    %147 = vector.load %arg13[%146, %c0_42, %c0_43] : memref<4x64x32xbf16, #tpu.memory_space<vmem>>, vector<1x64x32xbf16>
    %148 = vector.shape_cast %147 : vector<1x64x32xbf16> to vector<64x32xbf16>
    %cst_44 = arith.constant dense<0.000000e+00> : vector<12x32xf32>
    %149 = tpu.matmul %145, %148, %cst_44 {dimension_numbers = #tpu.dot_dimension_numbers<[1], [0], [0], [1], [0, 0, 1, 1], [], []>} : vector<12x64xbf16>, vector<64x32xbf16>, vector<12x32xf32> -> vector<12x32xf32>
    %150 = arith.index_cast %arg1 : i32 to index
    %c0_45 = arith.constant 0 : index
    %c0_46 = arith.constant 0 : index
    %151 = vector.load %arg14[%150, %c0_45, %c0_46] : memref<4x1x32xf32, #tpu.memory_space<vmem>>, vector<1x1x32xf32>
    %152 = vector.shape_cast %151 : vector<1x1x32xf32> to vector<1x32xf32>
    %153 = vector.broadcast %152 : vector<1x32xf32> to vector<12x32xf32>
    %154 = arith.addf %149, %153 : vector<12x32xf32>
    %155 = arith.addf %132, %154 : vector<12x32xf32>
    %156 = arith.index_cast %arg1 : i32 to index
    %c0_47 = arith.constant 0 : index
    %c0_48 = arith.constant 0 : index
    %157 = vector.load %arg15[%156, %c0_47, %c0_48] : memref<4x1x32xf32, #tpu.memory_space<vmem>>, vector<1x1x32xf32>
    %158 = vector.shape_cast %157 : vector<1x1x32xf32> to vector<1x32xf32>
    %159 = arith.index_cast %arg1 : i32 to index
    %c0_49 = arith.constant 0 : index
    %c0_50 = arith.constant 0 : index
    %160 = vector.load %arg16[%159, %c0_49, %c0_50] : memref<4x1x32xf32, #tpu.memory_space<vmem>>, vector<1x1x32xf32>
    %161 = vector.shape_cast %160 : vector<1x1x32xf32> to vector<1x32xf32>
    %cst_51 = arith.constant dense<0.000000e+00> : vector<12xf32>
    %162 = vector.multi_reduction <add>, %155, %cst_51 [1] : vector<12x32xf32> to vector<12xf32>
    %163 = vector.shape_cast %162 : vector<12xf32> to vector<12x1xf32>
    %cst_52 = arith.constant 3.200000e+01 : f32
    %164 = vector.broadcast %cst_52 : f32 to vector<12x1xf32>
    %165 = arith.divf %163, %164 : vector<12x1xf32>
    %166 = vector.broadcast %165 : vector<12x1xf32> to vector<12x32xf32>
    %167 = arith.subf %155, %166 : vector<12x32xf32>
    %168 = arith.mulf %167, %167 : vector<12x32xf32>
    %cst_53 = arith.constant dense<0.000000e+00> : vector<12xf32>
    %169 = vector.multi_reduction <add>, %168, %cst_53 [1] : vector<12x32xf32> to vector<12xf32>
    %170 = vector.shape_cast %169 : vector<12xf32> to vector<12x1xf32>
    %cst_54 = arith.constant 3.200000e+01 : f32
    %171 = vector.broadcast %cst_54 : f32 to vector<12x1xf32>
    %172 = arith.divf %170, %171 : vector<12x1xf32>
    %173 = vector.broadcast %165 : vector<12x1xf32> to vector<12x32xf32>
    %174 = arith.subf %155, %173 : vector<12x32xf32>
    %cst_55 = arith.constant 9.99999974E-6 : f32
    %175 = vector.broadcast %cst_55 : f32 to vector<12x1xf32>
    %176 = arith.addf %172, %175 : vector<12x1xf32>
    %177 = math.rsqrt %176 : vector<12x1xf32>
    %178 = vector.broadcast %177 : vector<12x1xf32> to vector<12x32xf32>
    %179 = arith.mulf %174, %178 : vector<12x32xf32>
    %180 = vector.broadcast %158 : vector<1x32xf32> to vector<12x32xf32>
    %181 = arith.mulf %179, %180 : vector<12x32xf32>
    %182 = vector.broadcast %161 : vector<1x32xf32> to vector<12x32xf32>
    %183 = arith.addf %181, %182 : vector<12x32xf32>
    %c0_56 = arith.constant 0 : index
    %c0_57 = arith.constant 0 : index
    %184 = vector.load %arg24[%c0_56, %c0_57] : memref<12x32xf32, #tpu.memory_space<vmem>>, vector<12x32xf32>
    tpu.vector_store %arg24[%c0_56, %c0_57], %183 {strides = array<i32>} : memref<12x32xf32, #tpu.memory_space<vmem>>, vector<12x32xf32>,
    %c3_i32 = arith.constant 3 : i32
    %185 = arith.cmpi eq, %arg1, %c3_i32 : i32
    %186 = arith.extui %185 : i1 to i32
    %c0_i32_58 = arith.constant 0 : i32
    %187 = arith.cmpi ne, %186, %c0_i32_58 : i32
    scf.if %187 {
      %188 = arith.truncf %183 : vector<12x32xf32> to vector<12x32xbf16>
      %c0_59 = arith.constant 0 : index
      %c0_60 = arith.constant 0 : index
      %189 = vector.load %arg17[%c0_59, %c0_60] : memref<32x64xbf16, #tpu.memory_space<vmem>>, vector<32x64xbf16>
      %cst_61 = arith.constant dense<0.000000e+00> : vector<12x64xf32>
      %190 = tpu.matmul %188, %189, %cst_61 {dimension_numbers = #tpu.dot_dimension_numbers<[1], [0], [0], [1], [0, 0, 1, 1], [], []>} : vector<12x32xbf16>, vector<32x64xbf16>, vector<12x64xf32> -> vector<12x64xf32>
      %c0_62 = arith.constant 0 : index
      %c0_63 = arith.constant 0 : index
      %191 = vector.load %arg18[%c0_62, %c0_63] : memref<1x64xf32, #tpu.memory_space<vmem>>, vector<1x64xf32>
      %192 = vector.broadcast %191 : vector<1x64xf32> to vector<12x64xf32>
      %193 = arith.addf %190, %192 : vector<12x64xf32>
      %cst_64 = arith.constant 0.000000e+00 : f32
      %194 = vector.broadcast %cst_64 : f32 to vector<12x64xf32>
      %195 = arith.maximumf %193, %194 : vector<12x64xf32>
      %c0_65 = arith.constant 0 : index
      %c0_66 = arith.constant 0 : index
      %196 = vector.load %arg19[%c0_65, %c0_66] : memref<64x1xf32, #tpu.memory_space<vmem>>, vector<64x1xf32>
      %cst_67 = arith.constant dense<0.000000e+00> : vector<12x1xf32>
      %197 = tpu.matmul %195, %196, %cst_67 {dimension_numbers = #tpu.dot_dimension_numbers<[1], [0], [0], [1], [0, 0, 1, 1], [], []>} : vector<12x64xf32>, vector<64x1xf32>, vector<12x1xf32> -> vector<12x1xf32>
      %c0_68 = arith.constant 0 : index
      %c0_69 = arith.constant 0 : index
      %198 = vector.load %arg20[%c0_68, %c0_69] : memref<1x1xf32, #tpu.memory_space<vmem>>, vector<1x1xf32>
      %199 = vector.broadcast %198 : vector<1x1xf32> to vector<12x1xf32>
      %200 = arith.addf %197, %199 : vector<12x1xf32>
      %cst_70 = arith.constant dense<0xFF800000> : vector<1xf32>
      %201 = vector.multi_reduction <maximumf>, %200, %cst_70 [0] : vector<12x1xf32> to vector<1xf32>
      %202 = vector.shape_cast %201 : vector<1xf32> to vector<1x1xf32>
      %203 = vector.broadcast %202 : vector<1x1xf32> to vector<12x1xf32>
      %204 = arith.subf %200, %203 : vector<12x1xf32>
      %205 = math.exp %204 : vector<12x1xf32>
      %cst_71 = arith.constant dense<0.000000e+00> : vector<1xf32>
      %206 = vector.multi_reduction <add>, %205, %cst_71 [0] : vector<12x1xf32> to vector<1xf32>
      %207 = vector.shape_cast %206 : vector<1xf32> to vector<1x1xf32>
      %208 = tpu.reciprocal %207 {approx = true} : vector<1x1xf32> -> vector<1x1xf32>
      %209 = vector.broadcast %208 : vector<1x1xf32> to vector<12x1xf32>
      %210 = arith.mulf %205, %209 : vector<12x1xf32>
      %211 = vector.broadcast %210 : vector<12x1xf32> to vector<12x32xf32>
      %212 = arith.mulf %211, %183 : vector<12x32xf32>
      %cst_72 = arith.constant dense<0.000000e+00> : vector<32xf32>
      %213 = vector.multi_reduction <add>, %212, %cst_72 [0] : vector<12x32xf32> to vector<32xf32>
      %214 = vector.shape_cast %213 : vector<32xf32> to vector<1x32xf32>
      %c0_73 = arith.constant 0 : index
      %c0_74 = arith.constant 0 : index
      %215 = vector.load %arg21[%c0_73, %c0_74] : memref<32x1xf32, #tpu.memory_space<vmem>>, vector<32x1xf32>
      %cst_75 = arith.constant dense<0.000000e+00> : vector<1x1xf32>
      %216 = tpu.matmul %214, %215, %cst_75 {dimension_numbers = #tpu.dot_dimension_numbers<[1], [0], [0], [1], [0, 0, 1, 1], [], []>} : vector<1x32xf32>, vector<32x1xf32>, vector<1x1xf32> -> vector<1x1xf32>
      %c0_76 = arith.constant 0 : index
      %c0_77 = arith.constant 0 : index
      %217 = vector.load %arg22[%c0_76, %c0_77] : memref<1x1xf32, #tpu.memory_space<vmem>>, vector<1x1xf32>
      %218 = arith.addf %216, %217 : vector<1x1xf32>
      %cst_78 = arith.constant 0.000000e+00 : f32
      %219 = vector.broadcast %cst_78 : f32 to vector<1x1xf32>
      %220 = arith.subf %219, %218 : vector<1x1xf32>
      %221 = math.exp %220 : vector<1x1xf32>
      %cst_79 = arith.constant 1.000000e+00 : f32
      %222 = vector.broadcast %cst_79 : f32 to vector<1x1xf32>
      %223 = arith.addf %222, %221 : vector<1x1xf32>
      %cst_80 = arith.constant 1.000000e+00 : f32
      %224 = vector.broadcast %cst_80 : f32 to vector<1x1xf32>
      %225 = arith.divf %224, %223 : vector<1x1xf32>
      %226 = vector.shape_cast %225 : vector<1x1xf32> to vector<1x1xf32>
      %227 = vector.broadcast %226 : vector<1x1xf32> to vector<1x128xf32>
      %c0_81 = arith.constant 0 : index
      %c0_82 = arith.constant 0 : index
      %c0_83 = arith.constant 0 : index
      %228 = vector.load %arg23[%c0_81, %c0_82, %c0_83] : memref<1x1x128xf32, #tpu.memory_space<vmem>>, vector<1x1x128xf32>
      %229 = vector.shape_cast %228 : vector<1x1x128xf32> to vector<1x128xf32>
      %230 = vector.shape_cast %227 : vector<1x128xf32> to vector<1x1x128xf32>
      tpu.vector_store %arg23[%c0_81, %c0_82, %c0_83], %230 {strides = array<i32>} : memref<1x1x128xf32, #tpu.memory_space<vmem>>, vector<1x1x128xf32>,
    } else {
    }
    return
  }
  func.func @transform_0(%arg0: i32, %arg1: i32) -> (i32, i32, i32) {
    %c0_i32 = arith.constant 0 : i32
    %c0_i32_0 = arith.constant 0 : i32
    %c0_i32_1 = arith.constant 0 : i32
    return %arg0, %c0_i32, %c0_i32_0 : i32, i32, i32
  }
  func.func @transform_1(%arg0: i32, %arg1: i32) -> (i32, i32) {
    %c0_i32 = arith.constant 0 : i32
    %c0_i32_0 = arith.constant 0 : i32
    %c0_i32_1 = arith.constant 0 : i32
    return %c0_i32, %c0_i32_0 : i32, i32
  }
  func.func @transform_2(%arg0: i32, %arg1: i32) -> (i32, i32) {
    %c0_i32 = arith.constant 0 : i32
    %c0_i32_0 = arith.constant 0 : i32
    %c0_i32_1 = arith.constant 0 : i32
    return %c0_i32, %c0_i32_0 : i32, i32
  }
  func.func @transform_3(%arg0: i32, %arg1: i32) -> (i32, i32, i32) {
    %c0_i32 = arith.constant 0 : i32
    %c0_i32_0 = arith.constant 0 : i32
    %c0_i32_1 = arith.constant 0 : i32
    %c0_i32_2 = arith.constant 0 : i32
    return %c0_i32, %c0_i32_0, %c0_i32_1 : i32, i32, i32
  }
  func.func @transform_4(%arg0: i32, %arg1: i32) -> (i32, i32, i32) {
    %c0_i32 = arith.constant 0 : i32
    %c0_i32_0 = arith.constant 0 : i32
    %c0_i32_1 = arith.constant 0 : i32
    %c0_i32_2 = arith.constant 0 : i32
    return %c0_i32, %c0_i32_0, %c0_i32_1 : i32, i32, i32
  }
  func.func @transform_5(%arg0: i32, %arg1: i32) -> (i32, i32, i32) {
    %c0_i32 = arith.constant 0 : i32
    %c0_i32_0 = arith.constant 0 : i32
    %c0_i32_1 = arith.constant 0 : i32
    %c0_i32_2 = arith.constant 0 : i32
    return %c0_i32, %c0_i32_0, %c0_i32_1 : i32, i32, i32
  }
  func.func @transform_6(%arg0: i32, %arg1: i32) -> (i32, i32, i32) {
    %c0_i32 = arith.constant 0 : i32
    %c0_i32_0 = arith.constant 0 : i32
    %c0_i32_1 = arith.constant 0 : i32
    %c0_i32_2 = arith.constant 0 : i32
    return %c0_i32, %c0_i32_0, %c0_i32_1 : i32, i32, i32
  }
  func.func @transform_7(%arg0: i32, %arg1: i32) -> (i32, i32, i32) {
    %c0_i32 = arith.constant 0 : i32
    %c0_i32_0 = arith.constant 0 : i32
    %c0_i32_1 = arith.constant 0 : i32
    %c0_i32_2 = arith.constant 0 : i32
    return %c0_i32, %c0_i32_0, %c0_i32_1 : i32, i32, i32
  }
  func.func @transform_8(%arg0: i32, %arg1: i32) -> (i32, i32, i32) {
    %c0_i32 = arith.constant 0 : i32
    %c0_i32_0 = arith.constant 0 : i32
    %c0_i32_1 = arith.constant 0 : i32
    %c0_i32_2 = arith.constant 0 : i32
    return %c0_i32, %c0_i32_0, %c0_i32_1 : i32, i32, i32
  }
  func.func @transform_9(%arg0: i32, %arg1: i32) -> (i32, i32, i32) {
    %c0_i32 = arith.constant 0 : i32
    %c0_i32_0 = arith.constant 0 : i32
    %c0_i32_1 = arith.constant 0 : i32
    %c0_i32_2 = arith.constant 0 : i32
    return %c0_i32, %c0_i32_0, %c0_i32_1 : i32, i32, i32
  }
  func.func @transform_10(%arg0: i32, %arg1: i32) -> (i32, i32, i32) {
    %c0_i32 = arith.constant 0 : i32
    %c0_i32_0 = arith.constant 0 : i32
    %c0_i32_1 = arith.constant 0 : i32
    %c0_i32_2 = arith.constant 0 : i32
    return %c0_i32, %c0_i32_0, %c0_i32_1 : i32, i32, i32
  }
  func.func @transform_11(%arg0: i32, %arg1: i32) -> (i32, i32, i32) {
    %c0_i32 = arith.constant 0 : i32
    %c0_i32_0 = arith.constant 0 : i32
    %c0_i32_1 = arith.constant 0 : i32
    %c0_i32_2 = arith.constant 0 : i32
    return %c0_i32, %c0_i32_0, %c0_i32_1 : i32, i32, i32
  }
  func.func @transform_12(%arg0: i32, %arg1: i32) -> (i32, i32, i32) {
    %c0_i32 = arith.constant 0 : i32
    %c0_i32_0 = arith.constant 0 : i32
    %c0_i32_1 = arith.constant 0 : i32
    %c0_i32_2 = arith.constant 0 : i32
    return %c0_i32, %c0_i32_0, %c0_i32_1 : i32, i32, i32
  }
  func.func @transform_13(%arg0: i32, %arg1: i32) -> (i32, i32, i32) {
    %c0_i32 = arith.constant 0 : i32
    %c0_i32_0 = arith.constant 0 : i32
    %c0_i32_1 = arith.constant 0 : i32
    %c0_i32_2 = arith.constant 0 : i32
    return %c0_i32, %c0_i32_0, %c0_i32_1 : i32, i32, i32
  }
  func.func @transform_14(%arg0: i32, %arg1: i32) -> (i32, i32, i32) {
    %c0_i32 = arith.constant 0 : i32
    %c0_i32_0 = arith.constant 0 : i32
    %c0_i32_1 = arith.constant 0 : i32
    %c0_i32_2 = arith.constant 0 : i32
    return %c0_i32, %c0_i32_0, %c0_i32_1 : i32, i32, i32
  }
  func.func @transform_15(%arg0: i32, %arg1: i32) -> (i32, i32) {
    %c0_i32 = arith.constant 0 : i32
    %c0_i32_0 = arith.constant 0 : i32
    %c0_i32_1 = arith.constant 0 : i32
    return %c0_i32, %c0_i32_0 : i32, i32
  }
  func.func @transform_16(%arg0: i32, %arg1: i32) -> (i32, i32) {
    %c0_i32 = arith.constant 0 : i32
    %c0_i32_0 = arith.constant 0 : i32
    %c0_i32_1 = arith.constant 0 : i32
    return %c0_i32, %c0_i32_0 : i32, i32
  }
  func.func @transform_17(%arg0: i32, %arg1: i32) -> (i32, i32) {
    %c0_i32 = arith.constant 0 : i32
    %c0_i32_0 = arith.constant 0 : i32
    %c0_i32_1 = arith.constant 0 : i32
    return %c0_i32, %c0_i32_0 : i32, i32
  }
  func.func @transform_18(%arg0: i32, %arg1: i32) -> (i32, i32) {
    %c0_i32 = arith.constant 0 : i32
    %c0_i32_0 = arith.constant 0 : i32
    %c0_i32_1 = arith.constant 0 : i32
    return %c0_i32, %c0_i32_0 : i32, i32
  }
  func.func @transform_19(%arg0: i32, %arg1: i32) -> (i32, i32) {
    %c0_i32 = arith.constant 0 : i32
    %c0_i32_0 = arith.constant 0 : i32
    %c0_i32_1 = arith.constant 0 : i32
    return %c0_i32, %c0_i32_0 : i32, i32
  }
  func.func @transform_20(%arg0: i32, %arg1: i32) -> (i32, i32) {
    %c0_i32 = arith.constant 0 : i32
    %c0_i32_0 = arith.constant 0 : i32
    %c0_i32_1 = arith.constant 0 : i32
    return %c0_i32, %c0_i32_0 : i32, i32
  }
  func.func @transform_21(%arg0: i32, %arg1: i32) -> (i32, i32, i32) {
    %c0_i32 = arith.constant 0 : i32
    %c0_i32_0 = arith.constant 0 : i32
    %c0_i32_1 = arith.constant 0 : i32
    return %arg0, %c0_i32, %c0_i32_0 : i32, i32, i32
  }
}

</mosaic_0001>

<bundles_post_ra>
// kernel: tpu_custom_call.1
= control target key start
LH: loop header
LB: loop body
LE: loop exit
PB: predicated region body
PF: predicated region fallthrough
CT: control target
= control target key end

     0   :  { %s3152_s0 = inlined_call_operand.vmem [shape: f32[2,12,16], index: 0, kind: input, shape index: {}]   ;;  %s3153_s1 = inlined_call_operand.vmem [shape: bf16[16,32], index: 1, kind: input, shape index: {}]   ;;  %s3154_s2 = inlined_call_operand.vmem [shape: f32[1,32], index: 2, kind: input, shape index: {}]   ;;  %s3155_s3 = inlined_call_operand.vmem [shape: bf16[4,32,96], index: 3, kind: input, shape index: {}]   ;;  %s3156_s4 = inlined_call_operand.vmem [shape: f32[4,1,96], index: 4, kind: input, shape index: {}]   ;;  %s3157_s5 = inlined_call_operand.vmem [shape: bf16[4,32,32], index: 5, kind: input, shape index: {}]   ;;  %s3158_s6 = inlined_call_operand.vmem [shape: f32[4,1,32], index: 6, kind: input, shape index: {}]   ;;  %s3159_s7 = inlined_call_operand.vmem [shape: f32[4,1,32], index: 7, kind: input, shape index: {}]   ;;  %s3160_s8 = inlined_call_operand.vmem [shape: f32[4,1,32], index: 8, kind: input, shape index: {}]   ;;  %s3161_s9 = inlined_call_operand.vmem [shape: bf16[4,32,64], index: 9, kind: input, shape index: {}]   ;;  %s3162_s10 = inlined_call_operand.vmem [shape: f32[4,1,64], index: 10, kind: input, shape index: {}]   ;;  %s3163_s11 = inlined_call_operand.vmem [shape: bf16[4,64,32], index: 11, kind: input, shape index: {}]   ;;  %s3164_s12 = inlined_call_operand.vmem [shape: f32[4,1,32], index: 12, kind: input, shape index: {}]   ;;  %s3165_s13 = inlined_call_operand.vmem [shape: f32[4,1,32], index: 13, kind: input, shape index: {}]   ;;  %s3166_s14 = inlined_call_operand.vmem [shape: f32[4,1,32], index: 14, kind: input, shape index: {}]   ;;  %s3167_s15 = inlined_call_operand.vmem [shape: bf16[32,64], index: 15, kind: input, shape index: {}]   ;;  %s3168_s16 = inlined_call_operand.vmem [shape: f32[1,64], index: 16, kind: input, shape index: {}]   ;;  %s3169_s17 = inlined_call_operand.vmem [shape: f32[64,1], index: 17, kind: input, shape index: {}]   ;;  %s3170_s18 = inlined_call_operand.<no memory space> [shape: f32[1,1], index: 18, kind: input, shape index: {}]   ;;  %s3171_s19 = inlined_call_operand.vmem [shape: f32[32,1], index: 19, kind: input, shape index: {}]   ;;  %s3172_s21 = inlined_call_operand.hbm [shape: f32[2,1,128], index: 21, kind: output, shape index: {}]   ;;  %s3173_s20 = inlined_call_operand.<no memory space> [shape: f32[1,1], index: 20, kind: input, shape index: {}]  }
   0x1   :  { %3181 = sst [smem:[#allocation14_spill]] %s3152_s0  ;;  %v26_v0 = vstv %s3170_s18  ;;  %v28_v1 = vstv %s3173_s20 }
   0x2   :  { %3182 = sst [smem:[#allocation15_spill]] %s3153_s1  ;;  %27 = vst [vmem:[#allocation3] sm:$0x1] %v26_v0  ;;  %29 = vst [vmem:[#allocation4] sm:$0x1] %v28_v1 }
   0x3   :  { %3183 = sst [smem:[#allocation16_spill]] %s3154_s2 }
   0x4   :  { %3184 = sst [smem:[#allocation17_spill]] %s3155_s3 }
   0x5   :  { %3185 = sst [smem:[#allocation18_spill]] %s3156_s4 }
   0x6   :  { %3186 = sst [smem:[#allocation19_spill]] %s3157_s5 }
   0x7   :  { %3187 = sst [smem:[#allocation20_spill]] %s3158_s6 }
   0x8   :  { %3188 = sst [smem:[#allocation21_spill]] %s3172_s21 }
   0x9   :  { %30 = vsyncpa [#allocation6], 0 }
   0xa   :  { %32 = vsyncpa [#allocation6 + $0x1], 0  ;;  %s2755_s3 = smov 0   ;;  %s2757_s28 = smov 0  }
   0xb   :  { %s2759_s29 = smov 0   ;;  %s2761_s0 = smov 0  }
   0xc   :  { %s2763_s4 = smov 0   ;;  %s2765_s30 = smov 0  }
   0xd   :  { %s2767_s18 = smov 0   ;;  %s2769_s5 = smov 0  }
   0xe LB: > { %3189 = sst [smem:[#allocation8_spill]] %s2586_s3  ;;  %s2083_s20 = sadd.s32 4294967295, %s2614_s5   ;;  %s2614_s5 = sphi %s2769_s5, %s38_s5   ;;  %s2610_s18 = sphi %s2767_s18, %s3215_s18   ;;  %s2606_s30 = sphi %s2765_s30, %s3209_s30   ;;  %s2602_s4 = sphi %s2763_s4, %s3214_s4   ;;  %s2598_s0 = sphi %s2761_s0, %s3208_s0   ;;  %s2594_s29 = sphi %s2759_s29, %s3213_s29   ;;  %s2590_s28 = sphi %s2757_s28, %s3212_s28   ;;  %s2586_s3 = sphi %s2755_s3, %s3211_s3  }
   0xf   : > { %3190 = sst [smem:[#allocation9_spill]] %s2606_s30  ;;  %s2084_s22 = sadd.s32 4294967294, %s2614_s5  }
  0x10   : > { %3191 = sst [smem:[#allocation10_spill]] %s2614_s5  ;;  %s47_s23 = sadd.s32 1, %s2606_s30 }
  0x11   : > { %p48_p0 = scmp.ge.s32.totalorder %s47_s23, 4  ;;  %s50_s1 = sadd.s32 1, %s2610_s18 }
  0x12   : > { %p513_p1 = scmp.ne.s32.totalorder %s2594_s29, %s2590_s28  ;;  %p514_p2 = scmp.eq.s32.totalorder %s2083_s20, 7 }
  0x13   : > { %s3217_s23 = smov (%p48_p0, %s47_s23), 0  ;;  %s3219_s1 = smov (!%p48_p0, %s50_s1), %s2610_s18 }
  0x14   : > { %3192 = sst [smem:[#allocation11_spill]] %s3217_s23  ;;  %p2804_p3 = por %p514_p2, %p513_p1 }
  0x15   : > { %p519_p4 = scmp.ne.s32.totalorder %s2590_s28, %s2586_s3  ;;  %p52_p5 = scmp.ge.s32.totalorder %s3219_s1, 2 }
  0x16   : > { %p520_p6 = scmp.eq.s32.totalorder %s2084_s22, 7  ;;  %p2087_p7 = scmp.ge.s32.totalorder %s2614_s5, 1 }
  0x17   : > { %p606_p8 = scmp.lt.s32.totalorder %s2614_s5, 9  ;;  %s3221_s1 = smov (%p52_p5, %s3219_s1), 0 }
  0x18   : > { %3194 = sst [smem:[#allocation12_spill]] %s3221_s1  ;;  %p2814_p9 = por %p520_p6, %p519_p4 }
  0x19   : > { %p607_p10 = pnand %p2087_p7, %p606_p8  ;;  %s500_s25 = ssub.s32 %s2610_s18, %s3221_s1 }
  0x1a   : > { %s3195_s2 = scalar_select %p2814_p9, 1, 0 }
  0x1b   : > { %s503_s26 = sadd.s32 1, %s2594_s29  ;;  %p501_p11 = scmp.eq.s32.totalorder %s500_s25, 0 }
  0x1c   : > { %3196 = sst [smem:[#allocation13_spill]] %s3195_s2  ;;  %610 = sbr.rel (%p607_p10) target bundleno = 3878 (0xf26), region = 104 }
  0x1d   : > { %s2822_s27 = scalar_select %p501_p11, %s2594_s29, %s503_s26  }
  0x1e   : > { %s663_s20 = sand.u32 (!%p607_p10), 1, %s2590_s28   ;;  %p665_p12 = scmp.lt.s32.totalorder (!%p607_p10), %s2602_s4, 1 }
  0x1f   : > { %s3197_s5 = sld [smem:[#allocation14_spill]] (!%p607_p10)  ;;  %s2832_s2 = scalar_lea.vmem (!%p607_p10), [#allocation5], %s663_s20 }
  0x20   : > { %p2090_p13 = scmp.ne.s32.totalorder (!%p607_p10), %s2598_s0, 0 }
  0x23   : > { %s666_s22 = scalar_select %p665_p12, %s2602_s4, 1 }
  0x24   : > { %674 = sbr.rel (%p2090_p13) target bundleno = 263 (0x107), region = 108  ;;  %s3198_s1 = sld [smem:[#allocation15_spill]] (!%p2090_p13)  ;;  %v2616_v3 = vmov (!%p2090_p13), 0.0   ;;  %vm2617_vm0 = vmmov (!%p2090_p13), 0   ;;  %vm693_vm1 = vcmask (!%p2090_p13), 130048   ;;  %vm738_vm2 = vcmask (!%p2090_p13), 261120  }
  0x25   : > { %s2142_s23 = sshll.u32 %s666_s22, 4  ;;  %2197 = vmatprep.subr.bf16.mxu0 (!%p2090_p13), %v2616_v3  ;;  %2199 = vmatprep.mubr.msk.bf16.mxu0 (!%p2090_p13), %vm2617_vm0, %v2616_v3  ;;  %vm740_vm3 = vcmask (!%p2090_p13), 257024  }
  0x26   : > { %s669_s21 = scalar_lea.vmem %s3197_s5, %s2142_s23  ;;  %s3199_s5 = sld [smem:[#allocation16_spill]] (!%p2090_p13) }
  0x27   : > { %v675_v4 = vld [vmem:[%s669_s21] sm:$0xff] (!%p2090_p13)  ;;  %v676_v5 = vld [vmem:[%s669_s21 + $0x8] sm:$0xf] (!%p2090_p13) }
  0x28   : > { %v677_v6 = vpack.c.bf16 (!%p2090_p13), %v676_v5, %v675_v4 }
  0x2a   : > { %v2440_v2 = vld [vmem:[%s3198_s1] sm:$0xff] (!%p2090_p13)  }
  0x2b   : > { %2198 = vmatpush3.bf16.msra.mxu0 %v2440_v2 }
  0x2c   : > { %v2091_v7 = vld [vmem:[%s3199_s5] ss:$0 sm:$0xff] }
  0x2e   : > { %2200 = vmatmul.mubr.msk.bf16.vlgmr.msra.gmra.mrb[0].mxu0 %vm693_vm1, %v677_v6 }
 0x101   : > { %v731_v8 = vpop.f32.mrb[0].mxu0 }
 0x102   : > { %v732_v9 = vadd.f32 %v2091_v7, %v731_v8  ;;  %v2201_v10 = vpop.f32.mrb[1].mxu0 }
 0x103   : > { %v734_v11 = vpop.f32.mrb[2].mxu0 }
 0x104   : > { %739 = vst.msk [vmem:[#allocation2] sm:$0xff] %vm738_vm2, %v732_v9  ;;  %v735_v12 = vadd.f32 %v2091_v7, %v734_v11  ;;  %v2202_v13 = vpop.f32.mrb[3].mxu0 }
 0x106   : > { %741 = vst.msk [vmem:[#allocation2 + $0x8] sm:$0xf] %vm740_vm3, %v735_v12 }
 0x107 PF: > { %s2143_s21 = sshll.u32 %s2598_s0, 4  ;;  %v2618_v14 = vmov 0.0   ;;  %s3200_s22 = sld [smem:[#allocation17_spill]]  ;;  %vm2619_vm4 = vmmov 0   ;;  %vm772_vm5 = vcmask 261120   ;;  %vm821_vm6 = vcmask 64512  }
 0x108   : > { %2203 = vmatprep.subr.bf16.mxu0 %v2618_v14  ;;  %2207 = vmatprep.mubr.msk.bf16.mxu0 %vm2619_vm4, %v2618_v14  ;;  %s3201_s30 = sld [smem:[#allocation19_spill]]  ;;  %s3202_s3 = sld [smem:[#allocation18_spill]]  ;;  %vm869_vm7 = vcmask 97280   ;;  %vm873_vm8 = vcmask 93184   ;;  %vm899_vm9 = vcmask 1045504   ;;  %vm1339_vm10 = vcmask 130048  }
 0x109   : > { %2211 = vmatprep.subr.bf16.mxu1 %v2618_v14  ;;  %2213 = vmatprep.mubr.msk.bf16.mxu1 %vm2619_vm4, %v2618_v14  ;;  %s2621_s23 = smov 96   ;;  %s2622_s1 = smov 80   ;;  %vm1342_vm11 = vcmask 195584   ;;  %vm1425_vm12 = vcmask 257024   ;;  %vm1583_vm13 = vcmask 523264  }
 0x10a   : > { %s2624_s26 = smov 72   ;;  %s3203_s6 = sld [smem:[#allocation20_spill]] }
 0x10b   : > { %v2848_v16 = vld [vmem:[#allocation2] sm:$0xff]  ;;  %p2130_p0 = scmp.ne.s32.totalorder %s2598_s0, 3 }
 0x10c   : > { %vm2635_vm14 = vmmov (!%p2130_p0), 0   ;;  %vm1850_vm15 = vcmask (!%p2130_p0), 3072   ;;  %vm1848_vm0 = vcmask (!%p2130_p0), 7168  }
 0x10d   : > { %s747_s25 = scalar_lea.vmem %s3200_s22, %s2143_s21  ;;  %v2850_v17 = vld [vmem:[#allocation2 + $0x8] sm:$0xf]  ;;  %s2863_s22 = scalar_lea.vmem %s3161_s9, %s2143_s21 }
 0x10e   : > { %v2456_v15 = vld [vmem:[%s747_s25] sm:$0xff]   ;;  %s2858_s5 = scalar_lea.vmem %s3201_s30, %s2143_s21  ;;  %v2457_v18 = vld [vmem:[%s747_s25 + $0x8] sm:$0xff]   ;;  %v744_v19 = vpack.c.bf16 %v2850_v17, %v2848_v16  ;;  %s752_s30 = scalar_lea.vmem %s3202_s3, %s2598_s0 }
 0x10f   : > { %2204 = vmatpush3.bf16.msra.mxu0 %v2456_v15  ;;  %v2096_v20 = vld [vmem:[%s752_s30] ss:$0 sm:$0xff]  ;;  %s2620_s21 = smov 120   ;;  %s2623_s25 = smov 88  }
 0x110   : > { %2205 = vmatprep.subr.bf16.mxu0 %v2618_v14  ;;  %s2625_s3 = smov 112   ;;  %s2626_s30 = smov 104  }
 0x113   : > { %2206 = vmatpush3.bf16.msra.mxu0 %v2457_v18 }
 0x114   : > { %2217 = vmatprep.subr.bf16.mxu0 %v2618_v14 }
 0x116   : > { %2208 = vmatmul.mubr.msk.bf16.vlgmr.msra.gmra.mrb[0].mxu0 %vm772_vm5, %v744_v19 }
 0x117   : > { %2219 = vmatprep.mubr.msk.bf16.mxu0 %vm2619_vm4, %v2618_v14 }
 0x1e9   : > { %v810_v21 = vpop.f32.mrb[0].mxu0 }
 0x1ea   : > { %v2209_v22 = vpop.f32.mrb[1].mxu0  ;;  %v811_v24 = vadd.f32 %v2096_v20, %v810_v21 }
 0x1eb   : > { %v813_v23 = vpop.f32.mrb[2].mxu0 }
 0x1ec   : > { %v814_v25 = vadd.f32 %v2096_v20, %v813_v23  ;;  %v2210_v26 = vpop.f32.mrb[3].mxu0 }
 0x1ee   : > { %v2876_v27 = vpack.c.bf16 %v814_v25, %v811_v24 }
 0x1f0   : > { %944 = vrot.lane.b32.xlu1 %v2876_v27, %s2620_s21  ;;  %819 = vrot.lane.b32.xlu0 %v2876_v27, %s2621_s23  ;;  %s2627_s21 = smov 56   ;;  %s2628_s23 = smov 64  }
 0x1f4   : > { %1069 = vrot.lane.b32.xlu1 %v2876_v27, %s2622_s1  ;;  %946 = vrot.lane.b32.xlu0 %v2876_v27, %s2623_s25  ;;  %s2629_s1 = smov 48   ;;  %s2630_s25 = smov 40  }
 0x1f8   : > { %1192 = vrot.lane.b32.xlu1 %v2876_v27, %s2624_s26  ;;  %1067 = vrot.lane.b32.xlu0 %v2876_v27, %s2625_s3  ;;  %s2631_s26 = smov 8   ;;  %s2632_s3 = smov 16  }
 0x1fc   : > { %1190 = vrot.lane.b32.xlu0 %v2876_v27, %s2626_s30  ;;  %s2633_s30 = smov 24  }
 0x262   : > { %v820_v28 = vpop.permute.xlu0 %819  ;;  %v945_v31 = vpop.permute.xlu1 %944 }
 0x263   : > { %v826_v29 = vsel %vm821_vm6, %v820_v28, 0 }
 0x264   : > { %2212 = vmatpush3.bf16.xpose.msra.mxu1 %v826_v29 }
 0x265   : > { %2223 = vmatprep.subr.bf16.mxu1 %v2618_v14 }
 0x266   : > { %v947_v30 = vpop.permute.xlu0 %946  ;;  %v1070_v33 = vpop.permute.xlu1 %1069 }
 0x267   : > { %v952_v32 = vsel %vm821_vm6, %v947_v30, 0  ;;  %v1075_v34 = vsel %vm821_vm6, %v1070_v33, 0 }
 0x26a   : > { %v1193_v35 = vpop.permute.xlu1 %1192  ;;  %v1068_v36 = vpop.permute.xlu0 %1067 }
 0x26b   : > { %2214 = vmatmul.mubr.msk.bf16.vlgmr.msra.gmra.mrb[0].mxu1 %vm821_vm6, %v2876_v27  ;;  %v1198_v37 = vsel %vm821_vm6, %v1193_v35, 0 }
 0x26c   : > { %2224 = vmatpush3.bf16.xpose.msra.mxu1 %v952_v32  ;;  %2225 = vmatprep.mubr.msk.bf16.mxu1 %vm2619_vm4, %v2618_v14 }
 0x26d   : > { %2235 = vmatprep.subr.bf16.mxu1 %v2618_v14 }
 0x26e   : > { %v1191_v38 = vpop.permute.xlu0 %1190 }
 0x273   : > { %2226 = vmatmul.mubr.msk.bf16.vlgmr.msra.gmra.mrb[4].mxu1 %vm821_vm6, %v945_v31 }
 0x274   : > { %2236 = vmatpush3.bf16.xpose.msra.mxu1 %v1075_v34  ;;  %2237 = vmatprep.mubr.msk.bf16.mxu1 %vm2619_vm4, %v2618_v14 }
 0x275   : > { %2247 = vmatprep.subr.bf16.mxu1 %v2618_v14 }
 0x27b   : > { %2238 = vmatmul.mubr.msk.bf16.vlgmr.msra.gmra.mrb[8].mxu1 %vm821_vm6, %v1068_v36 }
 0x27c   : > { %2248 = vmatpush3.bf16.xpose.msra.mxu1 %v1198_v37  ;;  %2249 = vmatprep.mubr.msk.bf16.mxu1 %vm2619_vm4, %v2618_v14 }
 0x27d   : > { %2259 = vmatprep.subr.bf16.mxu1 %v2618_v14 }
 0x283   : > { %2250 = vmatmul.mubr.msk.bf16.vlgmr.msra.gmra.mrb[12].mxu1 %vm821_vm6, %v1191_v38 }
 0x284   : > { %2263 = vmatprep.mubr.msk.bf16.mxu1 %vm2619_vm4, %v2618_v14 }
 0x33e   : > { %v862_v39 = vpop.f32.mrb[0].mxu1 }
 0x33f   : > { %v2215_v40 = vpop.f32.mrb[1].mxu1  ;;  %v870_v41 = vsel %vm869_vm7, %v862_v39, -inf }
 0x340   : > { %871 = vmax.xlane.f32.xlu1 %v870_v41  ;;  %v865_v42 = vpop.f32.mrb[2].mxu1 }
 0x341   : > { %v2216_v43 = vpop.f32.mrb[3].mxu1  ;;  %v874_v44 = vsel %vm873_vm8, %v865_v42, -inf }
 0x342   : > { %875 = vmax.xlane.f32.xlu0 %v874_v44 }
 0x346   : > { %v988_v45 = vpop.f32.mrb[4].mxu1 }
 0x347   : > { %v2227_v46 = vpop.f32.mrb[5].mxu1  ;;  %v995_v47 = vsel %vm869_vm7, %v988_v45, -inf }
 0x348   : > { %996 = vmax.xlane.f32.xlu0 %v995_v47  ;;  %v991_v48 = vpop.f32.mrb[6].mxu1 }
 0x349   : > { %v2228_v49 = vpop.f32.mrb[7].mxu1  ;;  %v998_v50 = vsel %vm873_vm8, %v991_v48, -inf }
 0x34a   : > { %999 = vmax.xlane.f32.xlu1 %v998_v50 }
 0x34e   : > { %v1111_v51 = vpop.f32.mrb[8].mxu1 }
 0x34f   : > { %v2239_v52 = vpop.f32.mrb[9].mxu1  ;;  %v1118_v53 = vsel %vm869_vm7, %v1111_v51, -inf }
 0x350   : > { %1119 = vmax.xlane.f32.xlu0 %v1118_v53  ;;  %v1114_v54 = vpop.f32.mrb[10].mxu1 }
 0x351   : > { %v2240_v55 = vpop.f32.mrb[11].mxu1  ;;  %v1121_v56 = vsel %vm873_vm8, %v1114_v54, -inf }
 0x352   : > { %1122 = vmax.xlane.f32.xlu1 %v1121_v56 }
 0x356   : > { %v1234_v57 = vpop.f32.mrb[12].mxu1 }
 0x357   : > { %v2251_v58 = vpop.f32.mrb[13].mxu1  ;;  %v1241_v59 = vsel %vm869_vm7, %v1234_v57, -inf }
 0x358   : > { %1242 = vmax.xlane.f32.xlu0 %v1241_v59  ;;  %v1237_v60 = vpop.f32.mrb[14].mxu1 }
 0x359   : > { %v2252_v61 = vpop.f32.mrb[15].mxu1  ;;  %v1244_v62 = vsel %vm873_vm8, %v1237_v60, -inf }
 0x35a   : > { %1245 = vmax.xlane.f32.xlu1 %v1244_v62 }
 0x3cd   : > { %v872_v63 = vpop.xlane.xlu1 %871 }
 0x3ce   : > { %v877_v0 = vsub.f32 %v862_v39, %v872_v63 }
 0x3cf   : > { %v876_v1 = vpop.xlane.xlu0 %875 }
 0x3d0   : > { %v879_v2 = vmul.f32 1.442695, %v877_v0  ;;  %v878_v3 = vsub.f32 %v865_v42, %v876_v1 }
 0x3d2   : > { %2466 = vpow2.f32 %v879_v2  ;;  %v881_v4 = vmul.f32 1.442695, %v878_v3 }
 0x3d4   : > { %2468 = vpow2.f32 %v881_v4 }
 0x3d5   : > { %v997_v5 = vpop.xlane.xlu0 %996 }
 0x3d6   : > { %v1001_v6 = vsub.f32 %v988_v45, %v997_v5 }
 0x3d7   : > { %v1000_v15 = vpop.xlane.xlu1 %999 }
 0x3d8   : > { %v1003_v7 = vmul.f32 1.442695, %v1001_v6  ;;  %v1002_v18 = vsub.f32 %v991_v48, %v1000_v15 }
 0x3da   : > { %2470 = vpow2.f32 %v1003_v7  ;;  %v1005_v21 = vmul.f32 1.442695, %v1002_v18 }
 0x3dc   : > { %v2467_v8 = vpop.eup %2466  ;;  %2472 = vpow2.f32 %v1005_v21 }
 0x3dd   : > { %v883_v9 = vsel %vm869_vm7, %v2467_v8, 0.0  ;;  %v1120_v20 = vpop.xlane.xlu0 %1119 }
 0x3de   : > { %v2469_v10 = vpop.eup %2468  ;;  %884 = vadd.xlane.f32.xlu0 %v883_v9  ;;  %v1124_v24 = vsub.f32 %v1111_v51, %v1120_v20 }
 0x3df   : > { %v886_v11 = vsel %vm873_vm8, %v2469_v10, 0.0  ;;  %v1123_v19 = vpop.xlane.xlu1 %1122 }
 0x3e0   : > { %887 = vadd.xlane.f32.xlu1 %v886_v11  ;;  %v1125_v22 = vsub.f32 %v1114_v54, %v1123_v19  ;;  %v1126_v29 = vmul.f32 1.442695, %v1124_v24  ;;  %v2458_v24 = vld [vmem:[%s2858_s5] sm:$0xff]  }
 0x3e1   : > { %2260 = vmatpush3.bf16.msra.mxu1 %v2458_v24 }
 0x3e2   : > { %v1128_v26 = vmul.f32 1.442695, %v1125_v22  ;;  %2261 = vmatprep.subr.bf16.mxu1 %v2618_v14 }
 0x3e4   : > { %v2916_v12 = vpop.eup %2470  ;;  %2474 = vpow2.f32 %v1128_v26 }
 0x3e5   : > { %v1007_v13 = vsel %vm869_vm7, %v2916_v12, 0.0  ;;  %v1243_v25 = vpop.xlane.xlu0 %1242  ;;  %2476 = vpow2.f32 %v1126_v29 }
 0x3e6   : > { %1008 = vadd.xlane.f32.xlu0 %v1007_v13  ;;  %v1247_v30 = vsub.f32 %v1234_v57, %v1243_v25  ;;  %v2473_v33 = vpop.eup %2472 }
 0x3e7   : > { %v1246_v23 = vpop.xlane.xlu1 %1245  ;;  %v1010_v34 = vsel %vm873_vm8, %v2473_v33, 0.0 }
 0x3e8   : > { %v1248_v28 = vsub.f32 %v1237_v60, %v1246_v23  ;;  %v1249_v32 = vmul.f32 1.442695, %v1247_v30  ;;  %v2459_v30 = vld [vmem:[%s2858_s5 + $0x8] sm:$0xff]   ;;  %s1418_s5 = scalar_lea.vmem %s3159_s7, %s2598_s0 }
 0x3e9   : > { %2262 = vmatpush3.bf16.msra.mxu1 %v2459_v30  ;;  %v2113_v24 = vld [vmem:[%s1418_s5] ss:$0 sm:$0xff]  ;;  %s1551_s5 = scalar_lea.vmem %s3164_s12, %s2598_s0 }
 0x3ea   : > { %v1251_v31 = vmul.f32 1.442695, %v1248_v28  ;;  %2275 = vmatprep.subr.bf16.mxu1 %v2618_v14 }
 0x3ec   : > { %2478 = vpow2.f32 %v1251_v31 }
 0x3ed   : > { %2480 = vpow2.f32 %v1249_v32 }
 0x3ee   : > { %v2923_v35 = vpop.eup %2474 }
 0x3ef   : > { %v2477_v36 = vpop.eup %2476  ;;  %v1133_v37 = vsel %vm873_vm8, %v2923_v35, 0.0 }
 0x3f0   : > { %v1130_v39 = vsel %vm869_vm7, %v2477_v36, 0.0 }
 0x3f1   : > { %1018 = vrot.lane.b32.xlu1 %v2876_v27, %s2627_s21 }
 0x3f6   : > { %v2927_v38 = vpop.eup %2478 }
 0x3f7   : > { %v2930_v40 = vpop.eup %2480  ;;  %v1256_v41 = vsel %vm873_vm8, %v2927_v38, 0.0 }
 0x3f8   : > { %v1253_v42 = vsel %vm869_vm7, %v2930_v40, 0.0 }
 0x3fc   : > { %894 = vrot.lane.b32.xlu0 %v2876_v27, %s2628_s23  ;;  %s1352_s23 = scalar_lea.vmem %s3203_s6, %s2598_s0 }
 0x415   : > { %1011 = vadd.xlane.f32.xlu1 %v1010_v34 }
 0x419   : > { %1134 = vadd.xlane.f32.xlu1 %v1133_v37 }
 0x41b   : > { %1131 = vadd.xlane.f32.xlu0 %v1130_v39 }
 0x41d   : > { %1257 = vadd.xlane.f32.xlu1 %v1256_v41 }
 0x41f   : > { %1254 = vadd.xlane.f32.xlu0 %v1253_v42 }
 0x42e   : > { %1141 = vrot.lane.b32.xlu1 %v2876_v27, %s2629_s1  ;;  %s2146_s1 = sshll.u32 %s2598_s0, 5 }
 0x435   : > { %1264 = vrot.lane.b32.xlu0 %v2876_v27, %s2630_s25 }
 0x46b   : > { %v885_v43 = vpop.xlane.xlu0 %884 }
 0x46c   : > { %2482 = vrcp.f32 %v885_v43 }
 0x46d   : > { %v888_v44 = vpop.xlane.xlu1 %887 }
 0x46e   : > { %2484 = vrcp.f32 %v888_v44 }
 0x471   : > { %v1019_v52 = vpop.permute.xlu1 %1018 }
 0x472   : > { %v1024_v27 = vsel %vm899_vm9, %v1019_v52, 0 }
 0x473   : > { %v1009_v45 = vpop.xlane.xlu0 %1008 }
 0x474   : > { %2486 = vrcp.f32 %v1009_v45 }
 0x476   : > { %v2483_v46 = vpop.eup %2482 }
 0x477   : > { %v895_v47 = vpop.permute.xlu0 %894  ;;  %v891_v50 = vmul.f32 %v2483_v46, %v2467_v8 }
 0x478   : > { %v2485_v48 = vpop.eup %2484  ;;  %v901_v49 = vsel %vm899_vm9, %v895_v47, 0 }
 0x479   : > { %v892_v51 = vmul.f32 %v2485_v48, %v2469_v10  ;;  %2218 = vmatpush3.bf16.msra.mxu0 %v901_v49 }
 0x47a   : > { %2229 = vmatprep.subr.bf16.mxu0 %v2618_v14 }
 0x47b   : > { %v893_v53 = vpack.c.bf16 %v892_v51, %v891_v50 }
 0x47d   : > { %2220 = vmatmul.mubr.msk.bf16.vlgmr.msra.gmra.mrb[4].mxu0 %vm869_vm7, %v893_v53 }
 0x47e   : > { %2230 = vmatpush3.bf16.msra.mxu0 %v1024_v27  ;;  %2231 = vmatprep.mubr.msk.bf16.mxu0 %vm2619_vm4, %v2618_v14  ;;  %v2487_v58 = vpop.eup %2486 }
 0x47f   : > { %2241 = vmatprep.subr.bf16.mxu0 %v2618_v14  ;;  %v1015_v61 = vmul.f32 %v2487_v58, %v2916_v12 }
 0x4a2   : > { %v1012_v54 = vpop.xlane.xlu1 %1011 }
 0x4a3   : > { %2488 = vrcp.f32 %v1012_v54  ;;  %v2109_v54 = vld [vmem:[%s1352_s23] ss:$0 sm:$0xff] }
 0x4a6   : > { %v1135_v55 = vpop.xlane.xlu1 %1134 }
 0x4a7   : > { %2490 = vrcp.f32 %v1135_v55 }
 0x4a8   : > { %v1132_v56 = vpop.xlane.xlu0 %1131 }
 0x4a9   : > { %2492 = vrcp.f32 %v1132_v56 }
 0x4aa   : > { %v1258_v57 = vpop.xlane.xlu1 %1257 }
 0x4ac   : > { %v1255_v59 = vpop.xlane.xlu0 %1254 }
 0x4ad   : > { %v2489_v60 = vpop.eup %2488  ;;  %2494 = vrcp.f32 %v1255_v59 }
 0x4ae   : > { %v1016_v62 = vmul.f32 %v2489_v60, %v2473_v33  ;;  %v1142_v63 = vpop.permute.xlu1 %1141  ;;  %2496 = vrcp.f32 %v1258_v57 }
 0x4af   : > { %v1147_v2 = vsel %vm899_vm9, %v1142_v63, 0 }
 0x4b0   : > { %v1017_v0 = vpack.c.bf16 %v1016_v62, %v1015_v61  ;;  %v1265_v6 = vpop.permute.xlu0 %1264 }
 0x4b1   : > { %v2491_v1 = vpop.eup %2490  ;;  %v1270_v9 = vsel %vm899_vm9, %v1265_v6, 0 }
 0x4b2   : > { %2232 = vmatmul.mubr.msk.bf16.vlgmr.msra.gmra.mrb[8].mxu0 %vm869_vm7, %v1017_v0  ;;  %v1139_v5 = vmul.f32 %v2491_v1, %v2923_v35 }
 0x4b3   : > { %v2493_v3 = vpop.eup %2492  ;;  %2242 = vmatpush3.bf16.msra.mxu0 %v1147_v2  ;;  %2243 = vmatprep.mubr.msk.bf16.mxu0 %vm2619_vm4, %v2618_v14 }
 0x4b4   : > { %v1138_v4 = vmul.f32 %v2493_v3, %v2477_v36  ;;  %2253 = vmatprep.subr.bf16.mxu0 %v2618_v14 }
 0x4b6   : > { %v1140_v7 = vpack.c.bf16 %v1139_v5, %v1138_v4 }
 0x4b7   : > { %v2495_v8 = vpop.eup %2494 }
 0x4b8   : > { %v2497_v10 = vpop.eup %2496  ;;  %v1261_v11 = vmul.f32 %v2495_v8, %v2930_v40 }
 0x4b9   : > { %v1262_v12 = vmul.f32 %v2497_v10, %v2927_v38  ;;  %v2461_v10 = vld [vmem:[%s2863_s22 + $0x8] sm:$0xff]  }
 0x4ba   : > { %2244 = vmatmul.mubr.msk.bf16.vlgmr.msra.gmra.mrb[12].mxu0 %vm869_vm7, %v1140_v7 }
 0x4bb   : > { %2254 = vmatpush3.bf16.msra.mxu0 %v1270_v9  ;;  %2255 = vmatprep.mubr.msk.bf16.mxu0 %vm2619_vm4, %v2618_v14  ;;  %v1263_v13 = vpack.c.bf16 %v1262_v12, %v1261_v11  ;;  %v2460_v9 = vld [vmem:[%s2863_s22] sm:$0xff]   ;;  %s1473_s22 = scalar_lea.vmem %s3162_s10, %s2598_s0 }
 0x4bc   : > { %2267 = vmatprep.subr.bf16.mxu0 %v2618_v14 }
 0x4c2   : > { %2256 = vmatmul.mubr.msk.bf16.vlgmr.msra.gmra.mrb[16].mxu0 %vm869_vm7, %v1263_v13 }
 0x4c3   : > { %2271 = vmatprep.mubr.msk.bf16.mxu0 %vm2619_vm4, %v2618_v14  ;;  %2268 = vmatpush3.bf16.msra.mxu0 %v2460_v9 }
 0x4c4   : > { %2269 = vmatprep.subr.bf16.mxu0 %v2618_v14 }
 0x4c7   : > { %2270 = vmatpush3.bf16.msra.mxu0 %v2461_v10 }
 0x550   : > { %v937_v15 = vpop.f32.mrb[4].mxu0 }
 0x551   : > { %v2221_v18 = vpop.f32.mrb[5].mxu0 }
 0x552   : > { %v940_v19 = vpop.f32.mrb[6].mxu0 }
 0x553   : > { %v2222_v20 = vpop.f32.mrb[7].mxu0 }
 0x585   : > { %v1060_v21 = vpop.f32.mrb[8].mxu0 }
 0x586   : > { %v2233_v22 = vpop.f32.mrb[9].mxu0 }
 0x587   : > { %v1063_v23 = vpop.f32.mrb[10].mxu0 }
 0x588   : > { %v2441_v25 = vpack.i.bf16 %v1063_v23, %v1060_v21  ;;  %v2234_v26 = vpop.f32.mrb[11].mxu0 }
 0x58a   : > { %2442 = vrot.lane.b32.xlu1 %v2441_v25, %s2631_s26 }
 0x58d   : > { %v1183_v28 = vpop.f32.mrb[12].mxu0 }
 0x58e   : > { %v2245_v29 = vpop.f32.mrb[13].mxu0 }
 0x58f   : > { %v1186_v31 = vpop.f32.mrb[14].mxu0 }
 0x590   : > { %v2446_v32 = vpack.i.bf16 %v1186_v31, %v1183_v28  ;;  %v2246_v33 = vpop.f32.mrb[15].mxu0 }
 0x592   : > { %2447 = vrot.lane.b32.xlu0 %v2446_v32, %s2632_s3  ;;  %s2988_s3 = scalar_lea.vmem %s3163_s11, %s2146_s1  ;;  %s1420_s1 = scalar_lea.vmem %s3160_s8, %s2598_s0 }
 0x593   : > { %v2462_v11 = vld [vmem:[%s2988_s3] sm:$0xff]   ;;  %v2463_v12 = vld [vmem:[%s2988_s3 + $0x8] sm:$0xff]  }
 0x594   : > { %v2114_v29 = vld [vmem:[%s1420_s1] ss:$0 sm:$0xff]  ;;  %s1630_s1 = scalar_lea.vmem %s3165_s13, %s2598_s0 }
 0x595   : > { %v1306_v34 = vpop.f32.mrb[16].mxu0 }
 0x596   : > { %v2257_v35 = vpop.f32.mrb[17].mxu0 }
 0x597   : > { %v1309_v36 = vpop.f32.mrb[18].mxu0  ;;  %v2465_v35 = vld [vmem:[%s2988_s3 + $0x18] sm:$0xff]  }
 0x598   : > { %v2451_v37 = vpack.i.bf16 %v1309_v36, %v1306_v34  ;;  %v2258_v38 = vpop.f32.mrb[19].mxu0  ;;  %v2464_v34 = vld [vmem:[%s2988_s3 + $0x10] sm:$0xff]   ;;  %v2116_v36 = vld [vmem:[%s1473_s22] ss:$0 sm:$0xff]  ;;  %s1632_s22 = scalar_lea.vmem %s3166_s14, %s2598_s0 }
 0x599   : > { %v2129_v9 = vld [vmem:[%s1632_s22] ss:$0 sm:$0xff] }
 0x59a   : > { %2452 = vrot.lane.b32.xlu1 %v2451_v37, %s2633_s30 }
 0x5fc   : > { %v2443_v39 = vpop.permute.xlu1 %2442 }
 0x5fd   : > { %v2445_v41 = vunpack.i.h.bf16 %v2443_v39  ;;  %v2444_v42 = vunpack.i.l.bf16 %v2443_v39 }
 0x5ff   : > { %v1338_v46 = vsel %vm821_vm6, %v940_v19, %v2445_v41  ;;  %v1337_v47 = vsel %vm821_vm6, %v937_v15, %v2444_v42 }
 0x604   : > { %v2448_v40 = vpop.permute.xlu0 %2447 }
 0x605   : > { %v2450_v43 = vunpack.i.h.bf16 %v2448_v40  ;;  %v2449_v44 = vunpack.i.l.bf16 %v2448_v40 }
 0x607   : > { %v1341_v50 = vsel %vm1339_vm10, %v1338_v46, %v2450_v43  ;;  %v1340_v51 = vsel %vm1339_vm10, %v1337_v47, %v2449_v44 }
 0x60c   : > { %v2453_v45 = vpop.permute.xlu1 %2452 }
 0x60d   : > { %v2455_v48 = vunpack.i.h.bf16 %v2453_v45  ;;  %v2454_v49 = vunpack.i.l.bf16 %v2453_v45 }
 0x60f   : > { %v1344_v52 = vsel %vm1342_vm11, %v1341_v50, %v2455_v48  ;;  %v1343_v53 = vsel %vm1342_vm11, %v1340_v51, %v2454_v49 }
 0x610   : > { %v1345_v27 = vpack.c.bf16 %v1344_v52, %v1343_v53 }
 0x612   : > { %2264 = vmatmul.mubr.msk.bf16.vlgmr.msra.gmra.mrb[16].mxu1 %vm772_vm5, %v1345_v27 }
 0x613   : > { %2283 = vmatprep.mubr.msk.bf16.mxu1 %vm2619_vm4, %v2618_v14  ;;  %2276 = vmatpush3.bf16.msra.mxu1 %v2462_v11 }
 0x614   : > { %2277 = vmatprep.subr.bf16.mxu1 %v2618_v14 }
 0x617   : > { %2278 = vmatpush3.bf16.msra.mxu1 %v2463_v12 }
 0x618   : > { %2279 = vmatprep.subr.bf16.mxu1 %v2618_v14 }
 0x61b   : > { %2280 = vmatpush3.bf16.msra.mxu1 %v2464_v34 }
 0x61c   : > { %2281 = vmatprep.subr.bf16.mxu1 %v2618_v14  ;;  %v2122_v14 = vld [vmem:[%s1551_s5] ss:$0 sm:$0xff] }
 0x61f   : > { %2282 = vmatpush3.bf16.msra.mxu1 %v2465_v35  ;;  %v2131_v35 = vld [vmem:[%s3168_s16] ss:$0 sm:$0xff] (!%p2130_p0) }
 0x6e5   : > { %v1409_v55 = vpop.f32.mrb[16].mxu1 }
 0x6e6   : > { %v1410_v56 = vadd.f32 %v2109_v54, %v1409_v55  ;;  %v2265_v57 = vpop.f32.mrb[17].mxu1 }
 0x6e7   : > { %v1412_v58 = vpop.f32.mrb[18].mxu1 }
 0x6e8   : > { %v1413_v59 = vadd.f32 %v2109_v54, %v1412_v58  ;;  %v2266_v60 = vpop.f32.mrb[19].mxu1  ;;  %v1416_v61 = vadd.f32 %v1410_v56, %v2848_v16 }
 0x6ea   : > { %v1422_v62 = vsel %vm772_vm5, %v1416_v61, 0.0  ;;  %v1417_v63 = vadd.f32 %v1413_v59, %v2850_v17 }
 0x6eb   : > { %1423 = vadd.xlane.f32.xlu0 %v1422_v62 }
 0x6ec   : > { %v1426_v0 = vsel %vm1425_vm12, %v1417_v63, 0.0 }
 0x6ed   : > { %1427 = vadd.xlane.f32.xlu1 %v1426_v0 }
 0x778   : > { %v1424_v1 = vpop.xlane.xlu0 %1423 }
 0x779   : > { %v1430_v2 = vmul.f32 0.03125, %v1424_v1 }
 0x77a   : > { %v1428_v3 = vpop.xlane.xlu1 %1427 }
 0x77b   : > { %v1432_v4 = vsub.f32 %v1416_v61, %v1430_v2  ;;  %v1431_v5 = vmul.f32 0.03125, %v1428_v3 }
 0x77d   : > { %v1433_v6 = vsub.f32 %v1417_v63, %v1431_v5  ;;  %v1434_v7 = vmul.f32 %v1432_v4, %v1432_v4 }
 0x77f   : > { %v1436_v16 = vsel %vm772_vm5, %v1434_v7, 0.0  ;;  %v1435_v8 = vmul.f32 %v1433_v6, %v1433_v6 }
 0x780   : > { %1437 = vadd.xlane.f32.xlu0 %v1436_v16  ;;  %v2128_v16 = vld [vmem:[%s1630_s1] ss:$0 sm:$0xff] }
 0x781   : > { %v1439_v17 = vsel %vm1425_vm12, %v1435_v8, 0.0 }
 0x784   : > { %1440 = vadd.xlane.f32.xlu0 %v1439_v17 }
 0x80d   : > { %v1438_v13 = vpop.xlane.xlu0 %1437 }
 0x80e   : > { %v1442_v15 = vmul.f32 0.03125, %v1438_v13 }
 0x810   : > { %v1444_v18 = vadd.f32 1e-05, %v1442_v15 }
 0x811   : > { %v1441_v19 = vpop.xlane.xlu0 %1440 }
 0x812   : > { %2498 = vrsqrt.f32 %v1444_v18  ;;  %v1443_v20 = vmul.f32 0.03125, %v1441_v19  ;;  %v2508_v18 = vld [vmem:[%s3167_s15] sm:$0xff] (!%p2130_p0)   ;;  %v2634_v19 = vmov (!%p2130_p0), 0.0  }
 0x813   : > { %2287 = vmatprep.subr.bf16.mxu0 (!%p2130_p0), %v2634_v19 }
 0x814   : > { %v1445_v21 = vadd.f32 1e-05, %v1443_v20  ;;  %v2509_v20 = vld [vmem:[%s3167_s15 + $0x8] sm:$0xff] (!%p2130_p0)  }
 0x816   : > { %2500 = vrsqrt.f32 %v1445_v21  ;;  %v1752_v21 = vld [vmem:[%s3169_s17] sm:$0xff] (!%p2130_p0) }
 0x81c   : > { %v2499_v22 = vpop.eup %2498 }
 0x81d   : > { %v1448_v23 = vmul.f32 %v2499_v22, %v1432_v4  ;;  %v1753_v22 = vld [vmem:[%s3169_s17 + $0x8] sm:$0xff] (!%p2130_p0) }
 0x81f   : > { %v1456_v26 = vmul.f32 %v2113_v24, %v1448_v23  ;;  %v1754_v23 = vld [vmem:[%s3169_s17 + $0x10] sm:$0xff] (!%p2130_p0) }
 0x820   : > { %v2501_v25 = vpop.eup %2500 }
 0x821   : > { %v1449_v28 = vmul.f32 %v2501_v25, %v1433_v6  ;;  %v1464_v31 = vadd.f32 %v2114_v29, %v1456_v26  ;;  %v1755_v25 = vld [vmem:[%s3169_s17 + $0x18] sm:$0xff] (!%p2130_p0) }
 0x822   : > { %v2329_v26 = vpack.c.bf16 (!%p2130_p0), %v1755_v25, %v1754_v23 }
 0x823   : > { %v1457_v30 = vmul.f32 %v2113_v24, %v1449_v28  ;;  %v2325_v24 = vpack.c.bf16 (!%p2130_p0), %v1753_v22, %v1752_v21  ;;  %v1756_v28 = vld [vmem:[%s3169_s17 + $0x20] sm:$0xff] (!%p2130_p0) }
 0x825   : > { %v1465_v32 = vadd.f32 %v2114_v29, %v1457_v30  ;;  %v1757_v29 = vld [vmem:[%s3169_s17 + $0x28] sm:$0xff] (!%p2130_p0)  ;;  %2326 = vmatprep.subr.bf16.mxu1 (!%p2130_p0), %v2325_v24 }
 0x827   : > { %v1466_v33 = vpack.c.bf16 %v1465_v32, %v1464_v31 }
 0x829   : > { %2272 = vmatmul.mubr.msk.bf16.vlgmr.msra.gmra.mrb[20].mxu0 %vm772_vm5, %v1466_v33  ;;  %v1759_v33 = vld [vmem:[%s3169_s17 + $0x38] sm:$0xff] (!%p2130_p0) }
 0x82a   : > { %2288 = vmatpush3.bf16.msra.mxu0 (!%p2130_p0), %v2508_v18  ;;  %2291 = vmatprep.mubr.msk.bf16.mxu0 (!%p2130_p0), %vm2635_vm14, %v2634_v19  ;;  %v1900_v18 = vld [vmem:[%s3171_s19 + $0x10] sm:$0xff] (!%p2130_p0) }
 0x82b   : > { %2289 = vmatprep.subr.bf16.mxu0 (!%p2130_p0), %v2634_v19 }
 0x82e   : > { %2290 = vmatpush3.bf16.msra.mxu0 (!%p2130_p0), %v2509_v20 }
 0x8fc   : > { %v1530_v37 = vpop.f32.mrb[20].mxu0 }
 0x8fd   : > { %v1531_v38 = vadd.f32 %v2116_v36, %v1530_v37  ;;  %v2273_v39 = vpop.f32.mrb[21].mxu0 }
 0x8fe   : > { %v1533_v40 = vpop.f32.mrb[22].mxu0 }
 0x8ff   : > { %v1534_v41 = vadd.f32 %v2116_v36, %v1533_v40  ;;  %v2274_v42 = vpop.f32.mrb[23].mxu0  ;;  %v1537_v43 = vmax.f32 %v1531_v38, 0.0 }
 0x901   : > { %v1538_v44 = vmax.f32 %v1534_v41, 0.0 }
 0x903   : > { %v1539_v45 = vpack.c.bf16 %v1538_v44, %v1537_v43  ;;  %v2636_v44 = vmov (!%p2130_p0), 0  }
 0x904   : > { %2506 = vset.pattern.permute.xlu0 (!%p2130_p0), %v2636_v44  ;;  %2507 = vset.pattern.permute.xlu1 (!%p2130_p0), %v2636_v44 }
 0x905   : > { %2284 = vmatmul.mubr.msk.bf16.vlgmr.msra.gmra.mrb[20].mxu1 %vm1583_vm13, %v1539_v45  ;;  %v2135_v45 = vld [vmem:[#allocation3] ss:$0 sm:$0xff] (!%p2130_p0) }
 0x906   : > { %2328 = vmatpush3.bf16.msra.mxu1 (!%p2130_p0), %v2325_v24 }
 0x907   : > { %2330 = vmatprep.subr.bf16.mxu1 (!%p2130_p0), %v2329_v26 }
 0x90a   : > { %2332 = vmatpush3.bf16.msra.mxu1 (!%p2130_p0), %v2329_v26 }
 0x9d8   : > { %v1621_v46 = vpop.f32.mrb[20].mxu1 }
 0x9d9   : > { %v1622_v47 = vadd.f32 %v2122_v14, %v1621_v46  ;;  %v2285_v48 = vpop.f32.mrb[21].mxu1 }
 0x9da   : > { %v1624_v49 = vpop.f32.mrb[22].mxu1 }
 0x9db   : > { %v1625_v50 = vadd.f32 %v2122_v14, %v1624_v49  ;;  %v2286_v51 = vpop.f32.mrb[23].mxu1  ;;  %v1628_v52 = vadd.f32 %v1622_v47, %v1464_v31  ;;  %v2333_v31 = vpack.c.bf16 (!%p2130_p0), %v1757_v29, %v1756_v28 }
 0x9dd   : > { %v1634_v53 = vsel %vm772_vm5, %v1628_v52, 0.0  ;;  %v1629_v27 = vadd.f32 %v1625_v50, %v1465_v32  ;;  %2334 = vmatprep.subr.bf16.mxu1 (!%p2130_p0), %v2333_v31  ;;  %v1758_v32 = vld [vmem:[%s3169_s17 + $0x30] sm:$0xff] (!%p2130_p0) }
 0x9de   : > { %1635 = vadd.xlane.f32.xlu1 %v1634_v53  ;;  %2336 = vmatpush3.bf16.msra.mxu1 (!%p2130_p0), %v2333_v31  ;;  %v2337_v34 = vpack.c.bf16 (!%p2130_p0), %v1759_v33, %v1758_v32 }
 0x9df   : > { %v1637_v54 = vsel %vm1425_vm12, %v1629_v27, 0.0 }
 0x9e0   : > { %1638 = vadd.xlane.f32.xlu0 %v1637_v54  ;;  %2338 = vmatprep.subr.bf16.mxu1 (!%p2130_p0), %v2337_v34 }
 0x9e2   : > { %2340 = vmatpush3.bf16.msra.mxu1 (!%p2130_p0), %v2337_v34 }
 0xa6b   : > { %v1636_v55 = vpop.xlane.xlu1 %1635 }
 0xa6c   : > { %v1640_v56 = vmul.f32 0.03125, %v1636_v55 }
 0xa6d   : > { %v1639_v57 = vpop.xlane.xlu0 %1638 }
 0xa6e   : > { %v1642_v58 = vsub.f32 %v1628_v52, %v1640_v56  ;;  %v1641_v59 = vmul.f32 0.03125, %v1639_v57 }
 0xa70   : > { %v1643_v60 = vsub.f32 %v1629_v27, %v1641_v59  ;;  %v1644_v61 = vmul.f32 %v1642_v58, %v1642_v58 }
 0xa72   : > { %v1646_v62 = vsel %vm772_vm5, %v1644_v61, 0.0  ;;  %v1645_v63 = vmul.f32 %v1643_v60, %v1643_v60 }
 0xa73   : > { %1647 = vadd.xlane.f32.xlu1 %v1646_v62 }
 0xa74   : > { %v1649_v0 = vsel %vm1425_vm12, %v1645_v63, 0.0 }
 0xa75   : > { %1650 = vadd.xlane.f32.xlu0 %v1649_v0 }
 0xb00   : > { %v1648_v1 = vpop.xlane.xlu1 %1647 }
 0xb01   : > { %v1652_v2 = vmul.f32 0.03125, %v1648_v1 }
 0xb02   : > { %v1651_v3 = vpop.xlane.xlu0 %1650 }
 0xb03   : > { %v1654_v4 = vadd.f32 1e-05, %v1652_v2  ;;  %v1653_v5 = vmul.f32 0.03125, %v1651_v3 }
 0xb05   : > { %2502 = vrsqrt.f32 %v1654_v4  ;;  %v1655_v6 = vadd.f32 1e-05, %v1653_v5 }
 0xb07   : > { %2504 = vrsqrt.f32 %v1655_v6 }
 0xb0f   : > { %v2503_v7 = vpop.eup %2502 }
 0xb10   : > { %v1658_v8 = vmul.f32 %v2503_v7, %v1642_v58 }
 0xb11   : > { %v2505_v17 = vpop.eup %2504 }
 0xb12   : > { %v1666_v10 = vmul.f32 %v2128_v16, %v1658_v8  ;;  %v1659_v11 = vmul.f32 %v2505_v17, %v1643_v60  ;;  %1681 = sbr.rel (%p2130_p0) target bundleno = 3854 (0xf0e), region = 112 }
 0xb14   : > { %v3027_v12 = vadd.f32 %v2129_v9, %v1666_v10  ;;  %v1667_v13 = vmul.f32 %v2128_v16, %v1659_v11  ;;  %v1899_v10 = vld [vmem:[%s3171_s19 + $0x8] sm:$0xff] (!%p2130_p0) }
 0xb16   : > { %1676 = vst.msk [vmem:[#allocation2] sm:$0xff] %vm772_vm5, %v3027_v12  ;;  %v3031_v15 = vadd.f32 %v2129_v9, %v1667_v13  ;;  %v1898_v9 = vld [vmem:[%s3171_s19] sm:$0xff] (!%p2130_p0)  ;;  %v2637_v13 = vmov (!%p2130_p0), 0.0|0.0  }
 0xb17   : > { %v2342_v11 = vpack.c.bf16 (!%p2130_p0), %v1899_v10, %v1898_v9  ;;  %2341 = vmatprep.subr.bf16.mxu0 (!%p2130_p0), %v2637_v13 }
 0xb18   : > { %1677 = vst.msk [vmem:[#allocation2 + $0x8] sm:$0xf] %vm1425_vm12, %v3031_v15  ;;  %v1682_v30 = vpack.c.bf16 (!%p2130_p0), %v3031_v15, %v3027_v12 }
 0xb1a   : > { %2292 = vmatmul.mubr.msk.bf16.vlgmr.msra.gmra.mrb[0].mxu0 %vm772_vm5, %v1682_v30 }
 0xb1b   : > { %2322 = vmatprep.mubr.msk.f32.mxu0 %vm2635_vm14, %v2634_v19  ;;  %2343 = vmatpush3.bf16.msra.mxu0 %v2342_v11  ;;  %v1901_v19 = vld [vmem:[%s3171_s19 + $0x18] sm:$0xff] }
 0xb1c   : > { %2344 = vmatprep.subr.bf16.mxu0 %v2637_v13  ;;  %v2345_v20 = vpack.c.bf16 %v1901_v19, %v1900_v18 }
 0xb1f   : > { %2346 = vmatpush3.bf16.msra.mxu0 %v2345_v20 }
 0xbed   : > { %v1743_v36 = vpop.f32.mrb[0].mxu0 }
 0xbee   : > { %v2293_v37 = vpop.f32.mrb[1].mxu0  ;;  %v1744_v38 = vadd.f32 %v2131_v35, %v1743_v36 }
 0xbef   : > { %v1746_v39 = vpop.f32.mrb[2].mxu0 }
 0xbf0   : > { %v1747_v40 = vadd.f32 %v2131_v35, %v1746_v39  ;;  %v2294_v41 = vpop.f32.mrb[3].mxu0  ;;  %v1750_v42 = vmax.f32 %v1744_v38, 0.0  ;;  %v1902_v35 = vld [vmem:[#allocation4] sm:$0x1] }
 0xbf2   : > { %v1751_v43 = vmax.f32 %v1747_v40, 0.0  ;;  %2311 = vmatprep.mubr.msk.f32.mxu1 %vm1583_vm13, %v1750_v42 }
 0xbf4   : > { %2312 = vmatmul.mubr.msk.f32.vlgmr.msra.gmra.mrb[0].mxu1 %vm1583_vm13, %v1751_v43 }
 0xcc7   : > { %v2313_v14 = vpop.f32.mrb[0].mxu1 }
 0xcc8   : > { %v1845_v46 = vadd.f32 %v2313_v14, %v2135_v45  ;;  %v1839_v47 = vpop.f32.mrb[1].mxu1 }
 0xcc9   : > { %v1840_v48 = vadd.f32 %v2135_v45, %v1839_v47 }
 0xcca   : > { %v1851_v49 = vsel %vm1850_vm15, %v1845_v46, -inf }
 0xccb   : > { %v1849_v50 = vsel %vm1848_vm0, %v1840_v48, -inf }
 0xccc   : > { %v1852_v51 = vmax.f32 %v1849_v50, %v1851_v49 }
 0xcce   : > { %v1853_v52 = vrot.slane %v1852_v51, 4 }
 0xcd0   : > { %v1854_v53 = vmax.f32 %v1852_v51, %v1853_v52 }
 0xcd2   : > { %v1855_v27 = vrot.slane %v1854_v53, 2 }
 0xcd4   : > { %v1856_v54 = vmax.f32 %v1854_v53, %v1855_v27 }
 0xcd6   : > { %v1857_v55 = vrot.slane %v1856_v54, 1 }
 0xcd8   : > { %v1858_v56 = vmax.f32 %v1856_v54, %v1857_v55 }
 0xcda   : > { %v1859_v57 = vsub.f32 %v1840_v48, %v1858_v56  ;;  %v1860_v58 = vsub.f32 %v1845_v46, %v1858_v56 }
 0xcdc   : > { %v1861_v59 = vmul.f32 1.442695, %v1859_v57  ;;  %v1863_v60 = vmul.f32 1.442695, %v1860_v58 }
 0xcde   : > { %2510 = vpow2.f32 %v1861_v59 }
 0xcdf   : > { %2512 = vpow2.f32 %v1863_v60 }
 0xce8   : > { %v2511_v61 = vpop.eup %2510 }
 0xce9   : > { %v2513_v62 = vpop.eup %2512  ;;  %v1865_v63 = vsel %vm1848_vm0, %v2511_v61, 0.0 }
 0xcea   : > { %v1866_v0 = vsel %vm1850_vm15, %v2513_v62, 0.0 }
 0xceb   : > { %v1867_v1 = vadd.f32 %v1866_v0, %v1865_v63 }
 0xced   : > { %v1868_v2 = vrot.slane %v1867_v1, 4 }
 0xcef   : > { %v1869_v3 = vadd.f32 %v1868_v2, %v1867_v1 }
 0xcf1   : > { %v1870_v4 = vrot.slane %v1869_v3, 2 }
 0xcf3   : > { %v1871_v5 = vadd.f32 %v1870_v4, %v1869_v3 }
 0xcf5   : > { %v1872_v6 = vrot.slane %v1871_v5, 1 }
 0xcf7   : > { %v1873_v7 = vadd.f32 %v1872_v6, %v1871_v5 }
 0xcf9   : > { %2514 = vrcp.f32 %v1873_v7 }
 0xd03   : > { %v2515_v16 = vpop.eup %2514 }
 0xd04   : > { %v1875_v8 = vmul.f32 %v2515_v16, %v2511_v61  ;;  %v1876_v17 = vmul.f32 %v2515_v16, %v2513_v62 }
 0xd06   : > { %1879 = vperm.xlu0 %2506, %v1875_v8  }
 0xd0a   : > { %1884 = vperm.xlu0 %2506, %v1876_v17  }
 0xd85   : > { %v1880_v21 = vpop.permute.xlu0 %1879 }
 0xd86   : > { %v1887_v22 = vmul.f32 %v1880_v21, %v3027_v12 }
 0xd88   : > { %v1889_v25 = vsel %vm772_vm5, %v1887_v22, 0.0 }
 0xd89   : > { %v1885_v23 = vpop.permute.xlu0 %1884 }
 0xd8a   : > { %v1888_v24 = vmul.f32 %v1885_v23, %v3031_v15 }
 0xd8c   : > { %v1890_v26 = vsel %vm1425_vm12, %v1888_v24, 0.0 }
 0xd8d   : > { %v1891_v28 = vadd.f32 %v1890_v26, %v1889_v25 }
 0xd8f   : > { %v1892_v29 = vrot.slane %v1891_v28, 4 }
 0xd91   : > { %v1893_v30 = vadd.f32 %v1892_v29, %v1891_v28 }
 0xd93   : > { %v1894_v31 = vrot.slane %v1893_v30, 2 }
 0xd95   : > { %v1895_v32 = vadd.f32 %v1894_v31, %v1893_v30 }
 0xd97   : > { %v1896_v33 = vrot.slane %v1895_v32, 1 }
 0xd99   : > { %v1897_v34 = vadd.f32 %v1896_v33, %v1895_v32 }
 0xd9b   : > { %2323 = vmatmul.mubr.msk.f32.vlgmr.msra.gmra.mrb[4].mxu0 %vm772_vm5, %v1897_v34 }
 0xe6e   : > { %v1972_v36 = vpop.f32.mrb[4].mxu0 }
 0xe6f   : > { %v1973_v12 = vadd.f32 %v1972_v36, %v1902_v35  ;;  %v2324_v37 = vpop.f32.mrb[5].mxu0 }
 0xe71   : > { %v1976_v38 = vsub.f32 0.0, %v1973_v12 }
 0xe73   : > { %v1977_v15 = vmul.f32 1.442695, %v1976_v38 }
 0xe75   : > { %2516 = vpow2.f32 %v1977_v15 }
 0xe7f   : > { %v2517_v39 = vpop.eup %2516 }
 0xe80   : > { %v1979_v40 = vadd.f32 1.0, %v2517_v39 }
 0xe82   : > { %2518 = vrcp.f32 %v1979_v40 }
 0xe8c   : > { %v2519_v41 = vpop.eup %2518 }
 0xe8d   : > { %1984 = vperm.xlu1 %2507, %v2519_v41  }
 0xf0c   : > { %v1985_v42 = vpop.permute.xlu1 %1984 }
 0xf0d   : > { %1987 = vst [vmem:[%s2832_s2] sm:$0x1] %v1985_v42 }
 0xf0e PF: > { %s2139_s30 = sshll.u32 %s2602_s4, 4  ;;  %s3204_s21 = sld [smem:[#allocation21_spill]] }
 0xf0f   : > { %s2001_s1 = sshll.u32 %s2832_s2, 4  ;;  %s1989_s0 = scalar_lea.sflag [#allocation6], %s663_s20  ;;  %s2002_s1 = int_to_ptr.vmem [resolvable:$true] %s2001_s1 }
 0xf10   : > { %s2520_s25 = scalar_lea.vmem %s2002_s1, 16  ;;  %s2638_s26 = smov [#allocation5]  }
 0xf11   : > { %p2521_p1 = scmp.ne.s32.totalorder %s2002_s1, %s2520_s25  ;;  %s2524_s22 = sshll.u32 %s2638_s26, 4  ;;  %s2525_s22 = int_to_ptr.vmem [resolvable:$false] %s2524_s22 }
 0xf12   : > { %s2526_s6 = scalar_lea.vmem %s2525_s22, 32  ;;  %p2527_p5 = scmp.lt.s32.totalorder %s2002_s1, %s2525_s22 }
 0xf13   : > { %p2522_p2 = pnand %p2521_p1, %p2804_p3  ;;  %p2528_p6 = scmp.lt.s32.totalorder %s2526_s6, %s2520_s25 }
 0xf14   : > { %s3102_s23 = scalar_lea.hbm %s3204_s21, %s2139_s30 }
 0xf15   : > { %p2523_p4 = pneg %p2522_p2  ;;  %p2529_p7 = por %p2528_p6, %p2527_p5 }
 0xf17   : > { %p2530_p8 = pnand %p2529_p7, %p2523_p4 }
 0xf19   : > { %2533 = shalt.err (!%p2530_p8)
}
 0xf1a   : > { %s2534_s4 = scalar_lea.hbm %s3102_s23, 16  ;;  %s2538_s30 = scalar_lea.hbm %s3204_s21, 32 }
 0xf1b   : > { %p2535_p10 = scmp.ne.s32.totalorder %s3102_s23, %s2534_s4  ;;  %p2539_p13 = scmp.lt.u32.totalorder %s3102_s23, %s3204_s21 }
 0xf1c   : > { %p2540_p0 = scmp.lt.u32.totalorder %s2538_s30, %s2534_s4  ;;  %p2542_p2 = scmp.lt.u32.totalorder %s2534_s4, %s3102_s23 }
 0xf1d   : > { %p2536_p11 = pnand %p2535_p10, %p2804_p3 }
 0xf1e   : > { %p2541_p1 = por %p2540_p0, %p2539_p13 }
 0xf1f   : > { %p2537_p12 = pneg %p2536_p11 }
 0xf20   : > { %p2543_p4 = por %p2542_p2, %p2541_p1 }
 0xf22   : > { %p2544_p5 = pnand %p2543_p4, %p2537_p12 }
 0xf24   : > { %2547 = shalt.err (!%p2544_p5)
}
 0xf25   : > { %2347 = dma.vmem_to_hbm [thread:$0]  (%p2804_p3), %s2002_s1, 16, %s3102_s23, %s1989_s0  }
 0xf26 PF: > { %s3205_s6 = sld [smem:[#allocation10_spill]]  ;;  %s3206_s25 = sld [smem:[#allocation8_spill]] }
 0xf2c   : > { %p2353_p6 = scmp.ge.s32.totalorder %s3205_s6, 2  ;;  %s2013_s22 = sand.u32 1, %s3206_s25  }
 0xf2d   : > { %s2014_s2 = scalar_lea.sflag [#allocation6], %s2013_s22 }
 0xf2e   : > { %p2350_p7 = pnand %p2353_p6, %p2814_p9 }
 0xf30   : > { %2581 = dma.done.wait (!%p2350_p7), %s2014_s2, 16  }
 0xf31   : > { %2583 = vsyncadd (!%p2350_p7), %s2014_s2, 4294967280  ;;  %s38_s5 = sadd.s32 1, %s3205_s6   ;;  %s3208_s0 = sld [smem:[#allocation9_spill]] }
 0xf32   : > { %p35_p8 = scmp.ge.s32.totalorder %s38_s5, 10   ;;  %s3209_s30 = sld [smem:[#allocation11_spill]] }
 0xf33   : > { %s3210_s24 = sld [smem:[#allocation12_spill]]  ;;  %s3211_s3 = smov %s2590_s28 }
 0xf34   : > { %s3212_s28 = smov %s2594_s29  ;;  %s3213_s29 = smov %s2822_s27 }
 0xf35   : > { %s3214_s4 = smov %s2610_s18  ;;  %37 = sbr.rel (!%p35_p8) target bundleno = 14 (0xe), region = 159 }
 0xf39   : > { %s3215_s18 = smov %s3210_s24 }
 0xf3c   :  { %2018 = vsyncpa [#allocation6], 1 }
 0xf3d   :  { %2020 = vsyncpa [#allocation6 + $0x1], 1 }

</bundles_post_ra>
